<compile_context>
chip_gen: v7x
topology: tpu7x:2x2x1
jax: 0.10.0
libtpu: 0.0.40
codegen_flags: <defaults>
</compile_context>

<pallas_src>
import functools

import numpy as np
import jax
import jax.numpy as jnp
from jax.experimental import pallas as pl
from jax.experimental.pallas import tpu as pltpu


def _round_up(x, m):
    return ((x + m - 1) // m) * m


def _cdiv(a, b):
    return -(-a // b)


# ----------------------------------------------------------------------------- kernel


def _stft_loss_kernel(xf_ref, yf_ref, d_ref, out_ref, *,
                      F_pad, clamp_eps, pow_, mag_weight, log_weight):
    """One frame tile: windowed real DFT via MXU, magnitudes, fused weighted L1 partial."""
    xw = xf_ref[...]                 # (tm, W) bf16 frames (window folded into D)
    yw = yf_ref[...]
    d = d_ref[...]                   # (W, 2*F_pad) bf16: [hann*cos | hann*-sin]

    # One matmul per signal; same RHS reused back-to-back on the MXU.
    xri = jnp.dot(xw, d, preferred_element_type=jnp.float32)   # (tm, 2*F_pad)
    yri = jnp.dot(yw, d, preferred_element_type=jnp.float32)

    # Lane-aligned halves (F_pad % 128 == 0): real | imag.
    xr, xi = xri[:, :F_pad], xri[:, F_pad:]
    yr, yi = yri[:, :F_pad], yri[:, F_pad:]

    xs = xr * xr + xi * xi           # |STFT(x)|^2
    ys = yr * yr + yi * yi           # |STFT(y)|^2

    xm = jnp.sqrt(xs)                # |STFT(x)|
    ym = jnp.sqrt(ys)

    # log10(clamp(mag, eps) ** pow) == (pow/2) * log10(clamp(mag^2, eps^2))
    eps2 = clamp_eps * clamp_eps
    half_pow = 0.5 * pow_
    xl = half_pow * jnp.log10(jnp.maximum(xs, eps2))
    yl = half_pow * jnp.log10(jnp.maximum(ys, eps2))

    # Padded frequency columns and padded frame rows are identical (zero) for
    # x and y, so they contribute exactly 0 to both terms.
    elem = mag_weight * jnp.abs(xm - ym) + log_weight * jnp.abs(xl - yl)
    total = jnp.sum(elem)

    # Per-tile partial sum; (1, 8, 128) block keeps the output (8, 128)-tiled
    # and lets the M grid axis be "parallel" (megacore on v7x).
    out_ref[...] = jnp.broadcast_to(total, out_ref.shape).astype(out_ref.dtype)


# ----------------------------------------------------------------------------- glue


def _frame(sig, W, hop):
    """Reflect-pad (center=True) and frame a (B, C, T) signal -> (M, W) bf16."""
    pad = W // 2
    sp = jnp.pad(sig, ((0, 0), (0, 0), (pad, pad)), mode="reflect")
    sp = sp.astype(jnp.bfloat16)          # halve gather/DMA bytes; f32 accum in-kernel
    Tp = sp.shape[-1]
    n_frames = 1 + (Tp - W) // hop
    idx = jnp.arange(n_frames)[:, None] * hop + jnp.arange(W)[None, :]
    frames = sp[:, :, idx]                # (B, C, n_frames, W)
    return frames.reshape(-1, W)


def _dft_matrix(W):
    """Hann-folded one-sided real-DFT matrix [cos | -sin], F padded to 128-multiple."""
    F_true = W // 2 + 1
    F_pad = _round_up(F_true, 128)
    n = np.arange(W, dtype=np.float64)[:, None]
    k = np.arange(F_true, dtype=np.float64)[None, :]
    ang = 2.0 * np.pi * n * k / W
    win = 0.5 - 0.5 * np.cos(2.0 * np.pi * np.arange(W) / W)   # periodic hann
    dr = np.pad(win[:, None] * np.cos(ang), ((0, 0), (0, F_pad - F_true)))
    di = np.pad(win[:, None] * (-np.sin(ang)), ((0, 0), (0, F_pad - F_true)))
    d = np.concatenate([dr, di], axis=1)                        # (W, 2*F_pad)
    return jnp.asarray(d, dtype=jnp.bfloat16), F_true, F_pad


def _pick_tiles(M, W, F_pad, tm_max=512, budget_bytes=30 << 20):
    """Frame-tile size: big (>=512 when it fits), minimal row padding, VMEM-bounded."""
    F2 = 2 * F_pad
    cand = min(tm_max, _round_up(M, 8))
    while True:
        n_tiles = _cdiv(M, cand)
        tm = _round_up(_cdiv(M, n_tiles), 8)
        d_bytes = 2 * W * F2 * 2            # resident DFT (bf16, 2-buffer allocation)
        frame_bytes = 2 * 2 * tm * W * 2    # x & y frame tiles, double-buffered bf16
        work_bytes = 3 * tm * F2 * 4        # f32 matmul results + live temporaries
        budget = d_bytes + frame_bytes + work_bytes + (2 << 20)
        if budget <= budget_bytes or cand <= 64:
            break
        cand //= 2
    # Only override scoped VMEM when the footprint exceeds the v5e 16 MiB default.
    vmem_limit = None if budget <= (14 << 20) else (34 << 20)
    return tm, n_tiles, vmem_limit


def _scale_weighted_sum(xf, yf, W, d_mat, F_pad, clamp_eps, pow_,
                        mag_weight, log_weight):
    """Run the Pallas kernel for one STFT scale; returns the weighted L1 sum."""
    M = xf.shape[0]
    tm, n_tiles, vmem_limit = _pick_tiles(M, W, F_pad)
    Mp = tm * n_tiles
    if Mp != M:
        xf = jnp.pad(xf, ((0, Mp - M), (0, 0)))
        yf = jnp.pad(yf, ((0, Mp - M), (0, 0)))

    kern = functools.partial(_stft_loss_kernel, F_pad=F_pad, clamp_eps=clamp_eps,
                             pow_=pow_, mag_weight=mag_weight, log_weight=log_weight)

    partials = pl.pallas_call(
        kern,
        out_shape=jax.ShapeDtypeStruct((n_tiles, 8, 128), jnp.float32),
        grid=(n_tiles,),
        in_specs=[
            pl.BlockSpec((tm, W), lambda i: (i, 0)),          # x frame tile
            pl.BlockSpec((tm, W), lambda i: (i, 0)),          # y frame tile
            pl.BlockSpec((W, 2 * F_pad), lambda i: (0, 0)),   # DFT matrix: VMEM-resident
        ],
        out_specs=pl.BlockSpec((1, 8, 128), lambda i: (i, 0, 0)),
        compiler_params=pltpu.CompilerParams(
            dimension_semantics=("parallel",),
            vmem_limit_bytes=vmem_limit),
    )(xf, yf, d_mat)

    return jnp.sum(partials[:, 0, 0])


@functools.partial(jax.jit, static_argnames=(
    "window_lengths", "clamp_eps", "mag_weight", "log_weight", "pow_",
    "match_stride", "window_type"))
def multi_scale_stft_loss(x, y, window_lengths=(2048, 512), clamp_eps=1e-5,
                          mag_weight=1.0, log_weight=1.0, pow_=2.0,
                          match_stride=False, window_type="hann"):
    """Forward pass of MultiScaleSTFTLoss (loss_fn = L1 mean)."""
    if match_stride or window_type != "hann":
        raise NotImplementedError(
            "Only match_stride=False with a hann window is implemented.")
    loss = jnp.float32(0.0)
    for W in window_lengths:
        hop = W // 4
        xf = _frame(x, W, hop)
        yf = _frame(y, W, hop)
        d_mat, F_true, F_pad = _dft_matrix(W)
        wsum = _scale_weighted_sum(xf, yf, W, d_mat, F_pad, clamp_eps, pow_,
                                   mag_weight, log_weight)
        n_elems = xf.shape[0] * F_true      # true (unpadded) element count
        loss = loss + wsum / n_elems
    return loss


# ----------------------------------------------------------------------------- reference


def _ref_loss(x, y, window_lengths, clamp_eps=1e-5, mag_weight=1.0,
              log_weight=1.0, pow_=2.0):
    """Pure numpy reference (rfft-based) for correctness checking."""
    x = np.asarray(x); y = np.asarray(y)
    total = 0.0
    for W in window_lengths:
        hop = W // 4
        pad = W // 2
        win = 0.5 - 0.5 * np.cos(2.0 * np.pi * np.arange(W) / W)

        def frames(sig):
            sp = np.pad(sig, ((0, 0), (0, 0), (pad, pad)), mode="reflect")
            n = 1 + (sp.shape[-1] - W) // hop
            idx = np.arange(n)[:, None] * hop + np.arange(W)[None, :]
            return sp[:, :, idx].reshape(-1, W)

        xm = np.abs(np.fft.rfft(frames(x) * win, axis=-1))
        ym = np.abs(np.fft.rfft(frames(y) * win, axis=-1))
        total += log_weight * np.mean(np.abs(
            np.log10(np.maximum(xm, clamp_eps) ** pow_) -
            np.log10(np.maximum(ym, clamp_eps) ** pow_)))
        total += mag_weight * np.mean(np.abs(xm - ym))
    return total


if __name__ == "__main__":
    key = jax.random.PRNGKey(0)
    kx, ky = jax.random.split(key)
    B, C, T = 2, 1, 256
    x = jax.random.normal(kx, (B, C, T), dtype=jnp.float32)
    y = jax.random.normal(ky, (B, C, T), dtype=jnp.float32)

    # Small windows for the demo (module default is (2048, 512); hop = W // 4).
    window_lengths = (64, 16)

    out = multi_scale_stft_loss(x, y, window_lengths=window_lengths)
    out = jax.block_until_ready(out)

    ref = _ref_loss(x, y, window_lengths)
    assert np.isfinite(float(out))
    # bf16 frames / bf16 DFT constants with f32 MXU accumulation -> looser tol than f32.
    # TODO(synk): keep frames in f32 (bf16 only for D) if this loss drives training on
    # low-amplitude audio where bf16 quantization noise could dominate the L1 term.
    assert np.allclose(float(out), float(ref), rtol=1e-2, atol=1e-2), (float(out), float(ref))
    print("KERNEL_OK")
</pallas_src>

<mosaic_0001>
module attributes {stable_mosaic.version = 11 : i64} {
  func.func @_stft_loss_kernel(%arg0: i32, %arg1: memref<136x16xbf16, #tpu.memory_space<vmem>>, %arg2: memref<136x16xbf16, #tpu.memory_space<vmem>>, %arg3: memref<16x256xbf16, #tpu.memory_space<vmem>>, %arg4: memref<1x8x128xf32, #tpu.memory_space<vmem>>) attributes {dimension_semantics = [#tpu.dimension_semantics<parallel>], iteration_bounds = array<i64: 1>, scalar_prefetch = 0 : i64, scratch_operands = 0 : i64, tpu.core_type = #tpu.core_type<tc>, window_params = [{transform_indices = @transform_0, window_bounds = array<i64: 136, 16>}, {transform_indices = @transform_1, window_bounds = array<i64: 136, 16>}, {pipeline_mode = #tpu.pipeline_mode<synchronous>, transform_indices = @transform_2, window_bounds = array<i64: 16, 256>}, {transform_indices = @transform_3, window_bounds = array<i64: 1, 8, 128>}]} {
    %c0 = arith.constant 0 : index
    %c0_0 = arith.constant 0 : index
    %0 = vector.load %arg1[%c0, %c0_0] : memref<136x16xbf16, #tpu.memory_space<vmem>>, vector<136x16xbf16>
    %c0_1 = arith.constant 0 : index
    %c0_2 = arith.constant 0 : index
    %1 = vector.load %arg2[%c0_1, %c0_2] : memref<136x16xbf16, #tpu.memory_space<vmem>>, vector<136x16xbf16>
    %c0_3 = arith.constant 0 : index
    %c0_4 = arith.constant 0 : index
    %2 = vector.load %arg3[%c0_3, %c0_4] : memref<16x256xbf16, #tpu.memory_space<vmem>>, vector<16x256xbf16>
    %cst = arith.constant dense<0.000000e+00> : vector<136x256xf32>
    %3 = tpu.matmul %0, %2, %cst {dimension_numbers = #tpu.dot_dimension_numbers<[1], [0], [0], [1], [0, 0, 1, 1], [], []>} : vector<136x16xbf16>, vector<16x256xbf16>, vector<136x256xf32> -> vector<136x256xf32>
    %cst_5 = arith.constant dense<0.000000e+00> : vector<136x256xf32>
    %4 = tpu.matmul %1, %2, %cst_5 {dimension_numbers = #tpu.dot_dimension_numbers<[1], [0], [0], [1], [0, 0, 1, 1], [], []>} : vector<136x16xbf16>, vector<16x256xbf16>, vector<136x256xf32> -> vector<136x256xf32>
    %5 = vector.extract_strided_slice %3 {offsets = [0, 0], sizes = [136, 128], strides = [1, 1]} : vector<136x256xf32> to vector<136x128xf32>
    %6 = vector.extract_strided_slice %3 {offsets = [0, 128], sizes = [136, 128], strides = [1, 1]} : vector<136x256xf32> to vector<136x128xf32>
    %7 = vector.extract_strided_slice %4 {offsets = [0, 0], sizes = [136, 128], strides = [1, 1]} : vector<136x256xf32> to vector<136x128xf32>
    %8 = vector.extract_strided_slice %4 {offsets = [0, 128], sizes = [136, 128], strides = [1, 1]} : vector<136x256xf32> to vector<136x128xf32>
    %9 = arith.mulf %5, %5 : vector<136x128xf32>
    %10 = arith.mulf %6, %6 : vector<136x128xf32>
    %11 = arith.addf %9, %10 : vector<136x128xf32>
    %12 = arith.mulf %7, %7 : vector<136x128xf32>
    %13 = arith.mulf %8, %8 : vector<136x128xf32>
    %14 = arith.addf %12, %13 : vector<136x128xf32>
    %15 = math.sqrt %11 : vector<136x128xf32>
    %16 = math.sqrt %14 : vector<136x128xf32>
    %cst_6 = arith.constant 1.000000e-10 : f32
    %17 = vector.broadcast %cst_6 : f32 to vector<136x128xf32>
    %18 = arith.maximumf %11, %17 : vector<136x128xf32>
    %19 = math.log %18 : vector<136x128xf32>
    %cst_7 = arith.constant 0.434294492 : f32
    %20 = vector.broadcast %cst_7 : f32 to vector<136x128xf32>
    %21 = arith.mulf %19, %20 : vector<136x128xf32>
    %cst_8 = arith.constant 1.000000e+00 : f32
    %22 = vector.broadcast %cst_8 : f32 to vector<136x128xf32>
    %23 = arith.mulf %22, %21 : vector<136x128xf32>
    %cst_9 = arith.constant 1.000000e-10 : f32
    %24 = vector.broadcast %cst_9 : f32 to vector<136x128xf32>
    %25 = arith.maximumf %14, %24 : vector<136x128xf32>
    %26 = math.log %25 : vector<136x128xf32>
    %cst_10 = arith.constant 0.434294492 : f32
    %27 = vector.broadcast %cst_10 : f32 to vector<136x128xf32>
    %28 = arith.mulf %26, %27 : vector<136x128xf32>
    %cst_11 = arith.constant 1.000000e+00 : f32
    %29 = vector.broadcast %cst_11 : f32 to vector<136x128xf32>
    %30 = arith.mulf %29, %28 : vector<136x128xf32>
    %31 = arith.subf %15, %16 : vector<136x128xf32>
    %32 = math.absf %31 : vector<136x128xf32>
    %cst_12 = arith.constant 1.000000e+00 : f32
    %33 = vector.broadcast %cst_12 : f32 to vector<136x128xf32>
    %34 = arith.mulf %33, %32 : vector<136x128xf32>
    %35 = arith.subf %23, %30 : vector<136x128xf32>
    %36 = math.absf %35 : vector<136x128xf32>
    %cst_13 = arith.constant 1.000000e+00 : f32
    %37 = vector.broadcast %cst_13 : f32 to vector<136x128xf32>
    %38 = arith.mulf %37, %36 : vector<136x128xf32>
    %39 = arith.addf %34, %38 : vector<136x128xf32>
    %40 = vector.shape_cast %39 : vector<136x128xf32> to vector<1x136x128xf32>
    %cst_14 = arith.constant dense<0.000000e+00> : vector<1xf32>
    %41 = vector.multi_reduction <add>, %40, %cst_14 [1, 2] : vector<1x136x128xf32> to vector<1xf32>
    %42 = vector.shape_cast %41 : vector<1xf32> to vector<1x1x1xf32>
    %43 = vector.extract %42[0, 0, 0] : f32 from vector<1x1x1xf32>
    %44 = vector.broadcast %43 : f32 to vector<1x8x128xf32>
    %c0_15 = arith.constant 0 : index
    %c0_16 = arith.constant 0 : index
    %c0_17 = arith.constant 0 : index
    %45 = vector.load %arg4[%c0_15, %c0_16, %c0_17] : memref<1x8x128xf32, #tpu.memory_space<vmem>>, vector<1x8x128xf32>
    tpu.vector_store %arg4[%c0_15, %c0_16, %c0_17], %44 {strides = array<i32>} : memref<1x8x128xf32, #tpu.memory_space<vmem>>, vector<1x8x128xf32>,
    return
  }
  func.func @transform_0(%arg0: i32) -> (i32, i32) {
    %c0_i32 = arith.constant 0 : i32
    %c0_i32_0 = arith.constant 0 : i32
    return %arg0, %c0_i32 : i32, i32
  }
  func.func @transform_1(%arg0: i32) -> (i32, i32) {
    %c0_i32 = arith.constant 0 : i32
    %c0_i32_0 = arith.constant 0 : i32
    return %arg0, %c0_i32 : i32, i32
  }
  func.func @transform_2(%arg0: i32) -> (i32, i32) {
    %c0_i32 = arith.constant 0 : i32
    %c0_i32_0 = arith.constant 0 : i32
    %c0_i32_1 = arith.constant 0 : i32
    return %c0_i32, %c0_i32_0 : i32, i32
  }
  func.func @transform_3(%arg0: i32) -> (i32, i32, i32) {
    %c0_i32 = arith.constant 0 : i32
    %c0_i32_0 = arith.constant 0 : i32
    %c0_i32_1 = arith.constant 0 : i32
    return %arg0, %c0_i32, %c0_i32_0 : i32, i32, i32
  }
}

module attributes {stable_mosaic.version = 11 : i64} {
  func.func @_stft_loss_kernel(%arg0: i32, %arg1: memref<40x64xbf16, #tpu.memory_space<vmem>>, %arg2: memref<40x64xbf16, #tpu.memory_space<vmem>>, %arg3: memref<64x256xbf16, #tpu.memory_space<vmem>>, %arg4: memref<1x8x128xf32, #tpu.memory_space<vmem>>) attributes {dimension_semantics = [#tpu.dimension_semantics<parallel>], iteration_bounds = array<i64: 1>, scalar_prefetch = 0 : i64, scratch_operands = 0 : i64, tpu.core_type = #tpu.core_type<tc>, window_params = [{transform_indices = @transform_0, window_bounds = array<i64: 40, 64>}, {transform_indices = @transform_1, window_bounds = array<i64: 40, 64>}, {pipeline_mode = #tpu.pipeline_mode<synchronous>, transform_indices = @transform_2, window_bounds = array<i64: 64, 256>}, {transform_indices = @transform_3, window_bounds = array<i64: 1, 8, 128>}]} {
    %c0 = arith.constant 0 : index
    %c0_0 = arith.constant 0 : index
    %0 = vector.load %arg1[%c0, %c0_0] : memref<40x64xbf16, #tpu.memory_space<vmem>>, vector<40x64xbf16>
    %c0_1 = arith.constant 0 : index
    %c0_2 = arith.constant 0 : index
    %1 = vector.load %arg2[%c0_1, %c0_2] : memref<40x64xbf16, #tpu.memory_space<vmem>>, vector<40x64xbf16>
    %c0_3 = arith.constant 0 : index
    %c0_4 = arith.constant 0 : index
    %2 = vector.load %arg3[%c0_3, %c0_4] : memref<64x256xbf16, #tpu.memory_space<vmem>>, vector<64x256xbf16>
    %cst = arith.constant dense<0.000000e+00> : vector<40x256xf32>
    %3 = tpu.matmul %0, %2, %cst {dimension_numbers = #tpu.dot_dimension_numbers<[1], [0], [0], [1], [0, 0, 1, 1], [], []>} : vector<40x64xbf16>, vector<64x256xbf16>, vector<40x256xf32> -> vector<40x256xf32>
    %cst_5 = arith.constant dense<0.000000e+00> : vector<40x256xf32>
    %4 = tpu.matmul %1, %2, %cst_5 {dimension_numbers = #tpu.dot_dimension_numbers<[1], [0], [0], [1], [0, 0, 1, 1], [], []>} : vector<40x64xbf16>, vector<64x256xbf16>, vector<40x256xf32> -> vector<40x256xf32>
    %5 = vector.extract_strided_slice %3 {offsets = [0, 0], sizes = [40, 128], strides = [1, 1]} : vector<40x256xf32> to vector<40x128xf32>
    %6 = vector.extract_strided_slice %3 {offsets = [0, 128], sizes = [40, 128], strides = [1, 1]} : vector<40x256xf32> to vector<40x128xf32>
    %7 = vector.extract_strided_slice %4 {offsets = [0, 0], sizes = [40, 128], strides = [1, 1]} : vector<40x256xf32> to vector<40x128xf32>
    %8 = vector.extract_strided_slice %4 {offsets = [0, 128], sizes = [40, 128], strides = [1, 1]} : vector<40x256xf32> to vector<40x128xf32>
    %9 = arith.mulf %5, %5 : vector<40x128xf32>
    %10 = arith.mulf %6, %6 : vector<40x128xf32>
    %11 = arith.addf %9, %10 : vector<40x128xf32>
    %12 = arith.mulf %7, %7 : vector<40x128xf32>
    %13 = arith.mulf %8, %8 : vector<40x128xf32>
    %14 = arith.addf %12, %13 : vector<40x128xf32>
    %15 = math.sqrt %11 : vector<40x128xf32>
    %16 = math.sqrt %14 : vector<40x128xf32>
    %cst_6 = arith.constant 1.000000e-10 : f32
    %17 = vector.broadcast %cst_6 : f32 to vector<40x128xf32>
    %18 = arith.maximumf %11, %17 : vector<40x128xf32>
    %19 = math.log %18 : vector<40x128xf32>
    %cst_7 = arith.constant 0.434294492 : f32
    %20 = vector.broadcast %cst_7 : f32 to vector<40x128xf32>
    %21 = arith.mulf %19, %20 : vector<40x128xf32>
    %cst_8 = arith.constant 1.000000e+00 : f32
    %22 = vector.broadcast %cst_8 : f32 to vector<40x128xf32>
    %23 = arith.mulf %22, %21 : vector<40x128xf32>
    %cst_9 = arith.constant 1.000000e-10 : f32
    %24 = vector.broadcast %cst_9 : f32 to vector<40x128xf32>
    %25 = arith.maximumf %14, %24 : vector<40x128xf32>
    %26 = math.log %25 : vector<40x128xf32>
    %cst_10 = arith.constant 0.434294492 : f32
    %27 = vector.broadcast %cst_10 : f32 to vector<40x128xf32>
    %28 = arith.mulf %26, %27 : vector<40x128xf32>
    %cst_11 = arith.constant 1.000000e+00 : f32
    %29 = vector.broadcast %cst_11 : f32 to vector<40x128xf32>
    %30 = arith.mulf %29, %28 : vector<40x128xf32>
    %31 = arith.subf %15, %16 : vector<40x128xf32>
    %32 = math.absf %31 : vector<40x128xf32>
    %cst_12 = arith.constant 1.000000e+00 : f32
    %33 = vector.broadcast %cst_12 : f32 to vector<40x128xf32>
    %34 = arith.mulf %33, %32 : vector<40x128xf32>
    %35 = arith.subf %23, %30 : vector<40x128xf32>
    %36 = math.absf %35 : vector<40x128xf32>
    %cst_13 = arith.constant 1.000000e+00 : f32
    %37 = vector.broadcast %cst_13 : f32 to vector<40x128xf32>
    %38 = arith.mulf %37, %36 : vector<40x128xf32>
    %39 = arith.addf %34, %38 : vector<40x128xf32>
    %40 = vector.shape_cast %39 : vector<40x128xf32> to vector<1x40x128xf32>
    %cst_14 = arith.constant dense<0.000000e+00> : vector<1xf32>
    %41 = vector.multi_reduction <add>, %40, %cst_14 [1, 2] : vector<1x40x128xf32> to vector<1xf32>
    %42 = vector.shape_cast %41 : vector<1xf32> to vector<1x1x1xf32>
    %43 = vector.extract %42[0, 0, 0] : f32 from vector<1x1x1xf32>
    %44 = vector.broadcast %43 : f32 to vector<1x8x128xf32>
    %c0_15 = arith.constant 0 : index
    %c0_16 = arith.constant 0 : index
    %c0_17 = arith.constant 0 : index
    %45 = vector.load %arg4[%c0_15, %c0_16, %c0_17] : memref<1x8x128xf32, #tpu.memory_space<vmem>>, vector<1x8x128xf32>
    tpu.vector_store %arg4[%c0_15, %c0_16, %c0_17], %44 {strides = array<i32>} : memref<1x8x128xf32, #tpu.memory_space<vmem>>, vector<1x8x128xf32>,
    return
  }
  func.func @transform_0(%arg0: i32) -> (i32, i32) {
    %c0_i32 = arith.constant 0 : i32
    %c0_i32_0 = arith.constant 0 : i32
    return %arg0, %c0_i32 : i32, i32
  }
  func.func @transform_1(%arg0: i32) -> (i32, i32) {
    %c0_i32 = arith.constant 0 : i32
    %c0_i32_0 = arith.constant 0 : i32
    return %arg0, %c0_i32 : i32, i32
  }
  func.func @transform_2(%arg0: i32) -> (i32, i32) {
    %c0_i32 = arith.constant 0 : i32
    %c0_i32_0 = arith.constant 0 : i32
    %c0_i32_1 = arith.constant 0 : i32
    return %c0_i32, %c0_i32_0 : i32, i32
  }
  func.func @transform_3(%arg0: i32) -> (i32, i32, i32) {
    %c0_i32 = arith.constant 0 : i32
    %c0_i32_0 = arith.constant 0 : i32
    %c0_i32_1 = arith.constant 0 : i32
    return %arg0, %c0_i32, %c0_i32_0 : i32, i32, i32
  }
}

</mosaic_0001>

<bundles_post_ra>
// kernel: multi_scale_stft_loss.3
= control target key start
LH: loop header
LB: loop body
LE: loop exit
PB: predicated region body
PF: predicated region fallthrough
CT: control target
= control target key end

     0   :  { %v1234_v1 = vmov 0   ;;  %vm104_vm0 = vcmask 130048   ;;  %s2205_s2 = inlined_call_operand.vmem [shape: bf16[16,256], index: 2, kind: input, shape index: {}]   ;;  %s2206_s0 = inlined_call_operand.vmem [shape: bf16[136,16], index: 0, kind: input, shape index: {}]   ;;  %s2207_s1 = inlined_call_operand.vmem [shape: bf16[136,16], index: 1, kind: input, shape index: {}]   ;;  %s2208_s3 = inlined_call_operand.vmem [shape: f32[1,8,128], index: 3, kind: output, shape index: {}]  }
   0x1   :  { %v1077_v0 = vld [vmem:[%s2205_s2 + $0x4] ss:$8 sps:$4 sm:$0xff]   ;;  %164 = vmatprep.mubr.bf16.mxu0 %v1234_v1  ;;  %355 = vmatprep.mubr.bf16.mxu1 %v1234_v1  ;;  %v1079_v2 = vld [vmem:[%s2205_s2] ss:$8 sps:$4 sm:$0xff]   ;;  %v1084_v7 = vld [vmem:[%s2206_s0 + $0x10] sm:$0xff]  }
   0x2   :  { %132 = vmatprep.subr.bf16.mxu0 %v1077_v0  ;;  %323 = vmatprep.subr.bf16.mxu1 %v1077_v0  ;;  %v1080_v3 = vld [vmem:[%s2206_s0] sm:$0xff]   ;;  %v1082_v5 = vld [vmem:[%s2206_s0 + $0x8] sm:$0xff]   ;;  %v1085_v8 = vld [vmem:[%s2207_s1 + $0x10] sm:$0xff]  }
   0x3   :  { %133 = vmatpush1.bf16.msra.mxu0 %v1079_v2  ;;  %324 = vmatpush1.bf16.msra.mxu1 %v1079_v2  ;;  %v1081_v4 = vld [vmem:[%s2207_s1] sm:$0xff]   ;;  %v1083_v6 = vld [vmem:[%s2207_s1 + $0x8] sm:$0xff]   ;;  %v1086_v9 = vld [vmem:[%s2206_s0 + $0x18] sm:$0xff]  }
   0x4   :  { %v1087_v10 = vld [vmem:[%s2207_s1 + $0x18] sm:$0xff]   ;;  %v1088_v11 = vld [vmem:[%s2206_s0 + $0x20] sm:$0xff]   ;;  %v1090_v13 = vld [vmem:[%s2206_s0 + $0x28] sm:$0xff]  }
   0x5   :  { %v1089_v12 = vld [vmem:[%s2207_s1 + $0x20] sm:$0xff]   ;;  %v1091_v14 = vld [vmem:[%s2207_s1 + $0x28] sm:$0xff]   ;;  %v1092_v15 = vld [vmem:[%s2206_s0 + $0x30] sm:$0xff]  }
   0x6   :  { %1047 = vmatmul.mubr.msk.bf16.vlgmr.msra.gmra.mrb[0].mxu0 %vm104_vm0, %v1080_v3  ;;  %1065 = vmatmul.mubr.msk.bf16.vlgmr.msra.gmra.mrb[0].mxu1 %vm104_vm0, %v1081_v4  ;;  %v1093_v16 = vld [vmem:[%s2207_s1 + $0x30] sm:$0xff]   ;;  %v1094_v17 = vld [vmem:[%s2206_s0 + $0x38] sm:$0xff]   ;;  %v1096_v19 = vld [vmem:[%s2206_s0 + $0x40] ss:$0 sps:$4 sm:$0xff]  }
   0x7   :  { %174 = vmatprep.mubr.bf16.mxu0 %v1234_v1  ;;  %365 = vmatprep.mubr.bf16.mxu1 %v1234_v1  ;;  %v1095_v18 = vld [vmem:[%s2207_s1 + $0x38] sm:$0xff]   ;;  %v1097_v20 = vld [vmem:[%s2207_s1 + $0x40] ss:$0 sps:$4 sm:$0xff]  }
   0xe   :  { %1048 = vmatmul.mubr.msk.bf16.gmra.mrb[4].mxu0 %vm104_vm0, %v1082_v5  ;;  %1066 = vmatmul.mubr.msk.bf16.gmra.mrb[4].mxu1 %vm104_vm0, %v1083_v6 }
   0xf   :  { %184 = vmatprep.mubr.bf16.mxu0 %v1234_v1  ;;  %375 = vmatprep.mubr.bf16.mxu1 %v1234_v1 }
  0x16   :  { %1049 = vmatmul.mubr.msk.bf16.gmra.mrb[8].mxu0 %vm104_vm0, %v1084_v7  ;;  %1067 = vmatmul.mubr.msk.bf16.gmra.mrb[8].mxu1 %vm104_vm0, %v1085_v8 }
  0x17   :  { %194 = vmatprep.mubr.bf16.mxu0 %v1234_v1  ;;  %385 = vmatprep.mubr.bf16.mxu1 %v1234_v1 }
  0x1e   :  { %1050 = vmatmul.mubr.msk.bf16.gmra.mrb[12].mxu0 %vm104_vm0, %v1086_v9  ;;  %1068 = vmatmul.mubr.msk.bf16.gmra.mrb[12].mxu1 %vm104_vm0, %v1087_v10 }
  0x1f   :  { %204 = vmatprep.mubr.bf16.mxu0 %v1234_v1  ;;  %395 = vmatprep.mubr.bf16.mxu1 %v1234_v1 }
  0x26   :  { %1051 = vmatmul.mubr.msk.bf16.gmra.mrb[16].mxu0 %vm104_vm0, %v1088_v11  ;;  %1069 = vmatmul.mubr.msk.bf16.gmra.mrb[16].mxu1 %vm104_vm0, %v1089_v12 }
  0x27   :  { %214 = vmatprep.mubr.bf16.mxu0 %v1234_v1  ;;  %405 = vmatprep.mubr.bf16.mxu1 %v1234_v1 }
  0x2e   :  { %1052 = vmatmul.mubr.msk.bf16.gmra.mrb[20].mxu0 %vm104_vm0, %v1090_v13  ;;  %1070 = vmatmul.mubr.msk.bf16.gmra.mrb[20].mxu1 %vm104_vm0, %v1091_v14 }
  0x2f   :  { %224 = vmatprep.mubr.bf16.mxu0 %v1234_v1  ;;  %415 = vmatprep.mubr.bf16.mxu1 %v1234_v1 }
  0x36   :  { %1053 = vmatmul.mubr.msk.bf16.gmra.mrb[24].mxu0 %vm104_vm0, %v1092_v15  ;;  %1071 = vmatmul.mubr.msk.bf16.gmra.mrb[24].mxu1 %vm104_vm0, %v1093_v16 }
  0x37   :  { %234 = vmatprep.mubr.bf16.mxu0 %v1234_v1  ;;  %425 = vmatprep.mubr.bf16.mxu1 %v1234_v1 }
  0x3e   :  { %1054 = vmatmul.mubr.msk.bf16.gmra.mrb[28].mxu0 %vm104_vm0, %v1094_v17  ;;  %1072 = vmatmul.mubr.msk.bf16.gmra.mrb[28].mxu1 %vm104_vm0, %v1095_v18 }
  0x3f   :  { %244 = vmatprep.mubr.bf16.mxu0 %v1234_v1  ;;  %435 = vmatprep.mubr.bf16.mxu1 %v1234_v1 }
  0x46   :  { %1055 = vmatmul.mubr.msk.bf16.gmra.mrb[32].mxu0 %vm104_vm0, %v1096_v19  ;;  %1073 = vmatmul.mubr.msk.bf16.gmra.mrb[32].mxu1 %vm104_vm0, %v1097_v20 }
  0xd9   :  { %v166_v21 = vpop.f32.mrb[0].mxu0  ;;  %v357_v22 = vpop.f32.mrb[0].mxu1 }
  0xda   :  { %v444_v23 = vmul.f32 %v166_v21, %v166_v21  ;;  %v495_v24 = vmul.f32 %v357_v22, %v357_v22  ;;  %v168_v25 = vpop.f32.mrb[1].mxu0  ;;  %v359_v26 = vpop.f32.mrb[1].mxu1 }
  0xdb   :  { %v461_v27 = vmul.f32 %v168_v25, %v168_v25  ;;  %v512_v28 = vmul.f32 %v359_v26, %v359_v26  ;;  %v170_v29 = vpop.f32.mrb[2].mxu0  ;;  %v361_v30 = vpop.f32.mrb[2].mxu1 }
  0xdc   :  { %v445_v31 = vmul.f32 %v170_v29, %v170_v29  ;;  %v496_v32 = vmul.f32 %v361_v30, %v361_v30  ;;  %v172_v33 = vpop.f32.mrb[3].mxu0  ;;  %v363_v34 = vpop.f32.mrb[3].mxu1 }
  0xdd   :  { %v1333_v35 = vadd.f32 %v461_v27, %v444_v23  ;;  %v1335_v36 = vadd.f32 %v512_v28, %v495_v24  ;;  %v462_v37 = vmul.f32 %v172_v33, %v172_v33  ;;  %v513_v38 = vmul.f32 %v363_v34, %v363_v34 }
  0xdf   :  { %1098 = vrsqrt.f32 %v1333_v35  ;;  %v784_v39 = vmax.f32 %v1333_v35, 1e-10  ;;  %v852_v40 = vmax.f32 %v1335_v36, 1e-10  ;;  %v1341_v41 = vadd.f32 %v462_v37, %v445_v31 }
  0xe0   :  { %1100 = vrsqrt.f32 %v1335_v36  ;;  %v1343_v42 = vadd.f32 %v513_v38, %v496_v32  ;;  %vm548_vm1 = vcmp.eq.f32.partialorder %v1333_v35, inf  ;;  %vm550_vm2 = vcmp.eq.f32.partialorder %v1333_v35, 0.0 }
  0xe1   :  { %v176_v43 = vpop.f32.mrb[4].mxu0  ;;  %v367_v44 = vpop.f32.mrb[4].mxu1  ;;  %1102 = vlog2.f32 %v784_v39  ;;  %v785_v50 = vmax.f32 %v1341_v41, 1e-10  ;;  %v551_v0 = vand.u32 2147483648, %v1333_v35  ;;  %vm667_vm3 = vcmp.eq.f32.partialorder %v1335_v36, inf }
  0xe2   :  { %v178_v45 = vpop.f32.mrb[5].mxu0  ;;  %v369_v46 = vpop.f32.mrb[5].mxu1  ;;  %1104 = vlog2.f32 %v852_v40  ;;  %v446_v47 = vmul.f32 %v176_v43, %v176_v43  ;;  %v497_v51 = vmul.f32 %v367_v44, %v367_v44  ;;  %v853_v54 = vmax.f32 %v1343_v42, 1e-10 }
  0xe3   :  { %v180_v48 = vpop.f32.mrb[6].mxu0  ;;  %v371_v49 = vpop.f32.mrb[6].mxu1  ;;  %1106 = vrsqrt.f32 %v1341_v41  ;;  %v463_v55 = vmul.f32 %v178_v45, %v178_v45  ;;  %v514_v56 = vmul.f32 %v369_v46, %v369_v46  ;;  %vm669_vm4 = vcmp.eq.f32.partialorder %v1335_v36, 0.0 }
  0xe4   :  { %v182_v52 = vpop.f32.mrb[7].mxu0  ;;  %v373_v53 = vpop.f32.mrb[7].mxu1  ;;  %1108 = vrsqrt.f32 %v1343_v42  ;;  %v447_v58 = vmul.f32 %v180_v48, %v180_v48  ;;  %v498_v60 = vmul.f32 %v371_v49, %v371_v49  ;;  %v670_v8 = vand.u32 2147483648, %v1335_v36 }
  0xe5   :  { %1110 = vlog2.f32 %v785_v50  ;;  %v1349_v57 = vadd.f32 %v463_v55, %v446_v47  ;;  %v1351_v59 = vadd.f32 %v514_v56, %v497_v51  ;;  %v464_v61 = vmul.f32 %v182_v52, %v182_v52 }
  0xe6   :  { %1112 = vlog2.f32 %v853_v54  ;;  %v515_v62 = vmul.f32 %v373_v53, %v373_v53  ;;  %vm555_vm5 = vcmp.eq.f32.partialorder %v1341_v41, inf  ;;  %vm557_vm6 = vcmp.eq.f32.partialorder %v1341_v41, 0.0 }
  0xe7   :  { %1114 = vrsqrt.f32 %v1349_v57  ;;  %v786_v13 = vmax.f32 %v1349_v57, 1e-10  ;;  %v1381_v14 = vadd.f32 %v464_v61, %v447_v58  ;;  %v558_v22 = vand.u32 2147483648, %v1341_v41 }
  0xe8   :  { %1116 = vrsqrt.f32 %v1351_v59  ;;  %v1383_v15 = vadd.f32 %v515_v62, %v498_v60  ;;  %vm674_vm7 = vcmp.eq.f32.partialorder %v1343_v42, inf  ;;  %v854_v30 = vmax.f32 %v1351_v59, 1e-10 }
  0xe9   :  { %v1099_v63 = vpop.eup %1098  ;;  %v1357_v1 = vpop.f32.mrb[8].mxu0  ;;  %1118 = vrsqrt.f32 %v1381_v14  ;;  %vm676_vm8 = vcmp.eq.f32.partialorder %v1343_v42, 0.0  ;;  %v677_v37 = vand.u32 2147483648, %v1343_v42  ;;  %vm562_vm9 = vcmp.eq.f32.partialorder %v1349_v57, inf }
  0xea   :  { %v1359_v2 = vpop.f32.mrb[8].mxu1  ;;  %v1101_v3 = vpop.eup %1100  ;;  %v547_v4 = vmul.f32 %v1099_v63, %v1333_v35  ;;  %1120 = vlog2.f32 %v786_v13  ;;  %vm564_vm10 = vcmp.eq.f32.partialorder %v1349_v57, 0.0  ;;  %v565_v58 = vand.u32 2147483648, %v1349_v57 }
  0xeb   :  { %v1365_v5 = vpop.f32.mrb[9].mxu0  ;;  %v1367_v6 = vpop.f32.mrb[9].mxu1  ;;  %v666_v7 = vmul.f32 %v1101_v3, %v1335_v36  ;;  %1122 = vrsqrt.f32 %v1383_v15  ;;  %vm681_vm11 = vcmp.eq.f32.partialorder %v1351_v59, inf  ;;  %v787_v61 = vmax.f32 %v1381_v14, 1e-10 }
  0xec   :  { %v1373_v9 = vpop.f32.mrb[10].mxu0  ;;  %v1375_v10 = vpop.f32.mrb[10].mxu1  ;;  %v549_v12 = vsel %vm548_vm1, %v1333_v35, %v547_v4  ;;  %1124 = vlog2.f32 %v854_v30  ;;  %vm683_vm12 = vcmp.eq.f32.partialorder %v1351_v59, 0.0  ;;  %vm569_vm13 = vcmp.eq.f32.partialorder %v1381_v14, inf }
  0xed   :  { %v1103_v11 = vpop.eup %1102  ;;  %v1385_v16 = vpop.f32.mrb[11].mxu0  ;;  %v1391_v19 = vsel %vm550_vm2, %v551_v0, %v549_v12  ;;  %v668_v21 = vsel %vm667_vm3, %v1335_v36, %v666_v7  ;;  %v684_v0 = vand.u32 2147483648, %v1351_v59  ;;  %v855_v7 = vmax.f32 %v1383_v15, 1e-10 }
  0xee   :  { %v1387_v17 = vpop.f32.mrb[11].mxu1  ;;  %v1105_v18 = vpop.eup %1104  ;;  %v802_v20 = vmul.f32 0.6931472, %v1103_v11  ;;  %v1399_v24 = vsel %vm669_vm4, %v670_v8, %v668_v21  ;;  %v448_v8 = vmul.f32 %v1357_v1, %v1357_v1  ;;  %1126 = vlog2.f32 %v787_v61 }
  0xef   :  { %v1107_v23 = vpop.eup %1106  ;;  %v870_v25 = vmul.f32 0.6931472, %v1105_v18  ;;  %v920_v28 = vsub.f32 %v1391_v19, %v1399_v24  ;;  %vm571_vm14 = vcmp.eq.f32.partialorder %v1381_v14, 0.0  ;;  %vm688_vm15 = vcmp.eq.f32.partialorder %v1383_v15, inf }
  0xf0   :  { %v1109_v26 = vpop.eup %1108  ;;  %v1403_v27 = vmul.f32 0.4342945, %v802_v20  ;;  %v554_v29 = vmul.f32 %v1107_v23, %v1341_v41  ;;  %1128 = vlog2.f32 %v855_v7  ;;  %vm690_vm0 = vcmp.eq.f32.partialorder %v1383_v15, 0.0 }
  0xf1   :  { %v1111_v31 = vpop.eup %1110  ;;  %v1409_v32 = vmul.f32 0.4342945, %v870_v25  ;;  %v673_v33 = vmul.f32 %v1109_v26, %v1343_v42  ;;  %v1418_v38 = vpop.f32.mrb[12].mxu0 }
  0xf2   :  { %v1113_v34 = vpop.eup %1112  ;;  %v556_v35 = vsel %vm555_vm5, %v1341_v41, %v554_v29  ;;  %v804_v36 = vmul.f32 0.6931472, %v1111_v31  ;;  %v1420_v39 = vpop.f32.mrb[12].mxu1  ;;  %v691_v29 = vand.u32 2147483648, %v1383_v15  ;;  %v450_v19 = vmul.f32 %v1418_v38, %v1418_v38 }
  0xf3   :  { %v954_v40 = vsub.f32 %v1403_v27, %v1409_v32  ;;  %v1426_v43 = vsel %vm557_vm6, %v558_v22, %v556_v35  ;;  %v675_v44 = vsel %vm674_vm7, %v1343_v42, %v673_v33  ;;  %v872_v45 = vmul.f32 0.6931472, %v1113_v34  ;;  %v1431_v46 = vpop.f32.mrb[13].mxu0  ;;  %v1433_v47 = vpop.f32.mrb[13].mxu1 }
  0xf4   :  { %v1115_v48 = vpop.eup %1114  ;;  %v1435_v49 = vmul.f32 0.4342945, %v804_v36  ;;  %v1439_v50 = vsel %vm676_vm8, %v677_v37, %v675_v44  ;;  %v1442_v41 = vpop.f32.mrb[14].mxu0  ;;  %v572_v22 = vand.u32 2147483648, %v1381_v14  ;;  %v449_v35 = vmul.f32 %v1373_v9, %v1373_v9 }
  0xf5   :  { %v1444_v51 = vpop.f32.mrb[14].mxu1  ;;  %v1117_v52 = vpop.eup %1116  ;;  %v1446_v53 = vmul.f32 0.4342945, %v872_v45  ;;  %v921_v54 = vsub.f32 %v1426_v43, %v1439_v50  ;;  %v561_v55 = vmul.f32 %v1115_v48, %v1349_v57  ;;  %v500_v36 = vmul.f32 %v1375_v10, %v1375_v10 }
  0xf6   :  { %v1452_v42 = vpop.f32.mrb[15].mxu0  ;;  %v1454_v56 = vpop.f32.mrb[15].mxu1  ;;  %v680_v60 = vmul.f32 %v1117_v52, %v1351_v59  ;;  %v466_v52 = vmul.f32 %v1385_v16, %v1385_v16  ;;  %v517_v9 = vmul.f32 %v1387_v17, %v1387_v17  ;;  %v467_v27 = vmul.f32 %v1431_v46, %v1431_v46 }
  0xf7   :  { %v955_v62 = vsub.f32 %v1435_v49, %v1446_v53  ;;  %v563_v63 = vsel %vm562_vm9, %v1349_v57, %v561_v55  ;;  %v1119_v11 = vpop.eup %1118  ;;  %v499_v57 = vmul.f32 %v1359_v2, %v1359_v2  ;;  %v516_v2 = vmul.f32 %v1367_v6, %v1367_v6 }
  0xf8   :  { %v1467_v3 = vsel %vm564_vm10, %v565_v58, %v563_v63  ;;  %v682_v4 = vsel %vm681_vm11, %v1351_v59, %v680_v60  ;;  %v568_v18 = vmul.f32 %v1119_v11, %v1381_v14  ;;  %v465_v59 = vmul.f32 %v1365_v5, %v1365_v5  ;;  %v1121_v21 = vpop.eup %1120 }
  0xf9   :  { %v1473_v12 = vsel %vm683_vm12, %v684_v0, %v682_v4  ;;  %v1483_v20 = vpop.f32.mrb[16].mxu0  ;;  %v1485_v1 = vpop.f32.mrb[16].mxu1  ;;  %v1507_v34 = vadd.f32 %v516_v2, %v499_v57  ;;  %v806_v16 = vmul.f32 0.6931472, %v1121_v21  ;;  %v1547_v63 = vadd.f32 %v466_v52, %v449_v35 }
  0xfa   :  { %v922_v13 = vsub.f32 %v1467_v3, %v1473_v12  ;;  %v1492_v23 = vpop.f32.mrb[17].mxu0  ;;  %v1494_v25 = vpop.f32.mrb[17].mxu1  ;;  %v570_v5 = vsel %vm569_vm13, %v1381_v14, %v568_v18  ;;  %v1500_v30 = vadd.f32 %v465_v59, %v448_v8  ;;  %v1535_v14 = vand.u32 2147483647, %v920_v28 }
  0xfb   :  { %v1123_v26 = vpop.eup %1122  ;;  %v1502_v31 = vpop.f32.mrb[18].mxu0  ;;  %v1519_v48 = vsel %vm571_vm14, %v572_v22, %v570_v5  ;;  %v856_v61 = vmax.f32 %v1507_v34, 1e-10  ;;  %v1549_v0 = vadd.f32 %v517_v9, %v500_v36  ;;  %v501_v4 = vmul.f32 %v1420_v39, %v1420_v39 }
  0xfc   :  { %v1504_v33 = vpop.f32.mrb[18].mxu1  ;;  %v687_v6 = vmul.f32 %v1123_v26, %v1383_v15  ;;  %v1513_v37 = vpop.f32.mrb[19].mxu0  ;;  %1130 = vrsqrt.f32 %v1500_v30  ;;  %v788_v55 = vmax.f32 %v1500_v30, 1e-10  ;;  %2209 = vst [vmem:[#allocation2_spill] sm:$0xff] %v1535_v14  ;;  %v518_v32 = vmul.f32 %v1433_v47, %v1433_v47 }
  0xfd   :  { %v1515_v44 = vpop.f32.mrb[19].mxu1  ;;  %v1125_v45 = vpop.eup %1124  ;;  %1132 = vrsqrt.f32 %v1507_v34  ;;  %v1570_v38 = vand.u32 2147483647, %v921_v54  ;;  %v1575_v39 = vand.u32 2147483647, %v955_v62  ;;  %v1594_v53 = vadd.f32 %v467_v27, %v450_v19 }
  0xfe   :  { %v689_v10 = vsel %vm688_vm15, %v1383_v15, %v687_v6  ;;  %v874_v60 = vmul.f32 0.6931472, %v1125_v45  ;;  %v1545_v15 = vand.u32 2147483647, %v954_v40  ;;  %1134 = vlog2.f32 %v788_v55  ;;  %v1127_v8 = vpop.eup %1126 }
  0xff   :  { %v1537_v58 = vsel %vm690_vm0, %v691_v29, %v689_v10  ;;  %2211 = vst [vmem:[#allocation4_spill] sm:$0xff] %v1570_v38  ;;  %2212 = vst [vmem:[#allocation5_spill] sm:$0xff] %v1575_v39  ;;  %1136 = vlog2.f32 %v856_v61  ;;  %v1581_v47 = vmul.f32 0.4342945, %v806_v16  ;;  %v1129_v43 = vpop.eup %1128  ;;  %v1591_v49 = vand.u32 2147483647, %v922_v13 }
 0x100   :  { %2210 = vst [vmem:[#allocation3_spill] sm:$0xff] %v1545_v15  ;;  %v1583_v57 = vmul.f32 0.4342945, %v874_v60  ;;  %1138 = vrsqrt.f32 %v1547_v63  ;;  %v789_v50 = vmax.f32 %v1547_v63, 1e-10  ;;  %vm576_vm1 = vcmp.eq.f32.partialorder %v1500_v30, inf }
 0x101   :  { %v1553_v24 = vpop.f32.mrb[20].mxu0  ;;  %v1555_v28 = vpop.f32.mrb[20].mxu1  ;;  %2213 = vst [vmem:[#allocation6_spill] sm:$0xff] %v1581_v47  ;;  %2214 = vst [vmem:[#allocation7_spill] sm:$0xff] %v1591_v49  ;;  %v808_v62 = vmul.f32 0.6931472, %v1127_v8  ;;  %v1600_v21 = vadd.f32 %v518_v32, %v501_v4  ;;  %1140 = vrsqrt.f32 %v1549_v0  ;;  %v451_v26 = vmul.f32 %v1442_v41, %v1442_v41 }
 0x102   :  { %v1563_v40 = vpop.f32.mrb[21].mxu0  ;;  %v1565_v7 = vpop.f32.mrb[21].mxu1  ;;  %v857_v59 = vmax.f32 %v1549_v0, 1e-10  ;;  %vm578_vm2 = vcmp.eq.f32.partialorder %v1500_v30, 0.0  ;;  %v579_v3 = vand.u32 2147483648, %v1500_v30  ;;  %1142 = vlog2.f32 %v789_v50 }
 0x103   :  { %v1577_v46 = vpop.f32.mrb[22].mxu0  ;;  %v1579_v11 = vpop.f32.mrb[22].mxu1  ;;  %vm695_vm3 = vcmp.eq.f32.partialorder %v1507_v34, inf  ;;  %vm697_vm4 = vcmp.eq.f32.partialorder %v1507_v34, 0.0  ;;  %v698_v2 = vand.u32 2147483648, %v1507_v34  ;;  %v502_v6 = vmul.f32 %v1444_v51, %v1444_v51 }
 0x104   :  { %v1586_v18 = vpop.f32.mrb[23].mxu0  ;;  %v1596_v54 = vpop.f32.mrb[23].mxu1  ;;  %v876_v5 = vmul.f32 0.6931472, %v1129_v43  ;;  %v1618_v45 = vmul.f32 0.4342945, %v808_v62  ;;  %1144 = vlog2.f32 %v857_v59  ;;  %v468_v9 = vmul.f32 %v1452_v42, %v1452_v42 }
 0x105   :  { %v790_v52 = vmax.f32 %v1594_v53, 1e-10  ;;  %1146 = vrsqrt.f32 %v1594_v53  ;;  %v519_v16 = vmul.f32 %v1454_v56, %v1454_v56  ;;  %v858_v4 = vmax.f32 %v1600_v21, 1e-10 }
 0x106   :  { %v1131_v22 = vpop.eup %1130  ;;  %2215 = vst [vmem:[#allocation8_spill] sm:$0xff] %v1618_v45  ;;  %v1642_v27 = vadd.f32 %v468_v9, %v451_v26  ;;  %v452_v32 = vmul.f32 %v1483_v20, %v1483_v20  ;;  %v1650_v50 = vmul.f32 0.4342945, %v876_v5  ;;  %vm583_vm5 = vcmp.eq.f32.partialorder %v1547_v63, inf }
 0x107   :  { %v1133_v12 = vpop.eup %1132  ;;  %v575_v13 = vmul.f32 %v1131_v22, %v1500_v30  ;;  %1148 = vrsqrt.f32 %v1600_v21  ;;  %v1654_v62 = vadd.f32 %v519_v16, %v502_v6  ;;  %v469_v59 = vmul.f32 %v1492_v23, %v1492_v23 }
 0x108   :  { %v694_v29 = vmul.f32 %v1133_v12, %v1507_v34  ;;  %v1135_v42 = vpop.eup %1134  ;;  %2216 = vst [vmem:[#allocation9_spill] sm:$0xff] %v1650_v50  ;;  %1150 = vlog2.f32 %v790_v52  ;;  %v503_v23 = vmul.f32 %v1485_v1, %v1485_v1  ;;  %v791_v52 = vmax.f32 %v1642_v27, 1e-10 }
 0x109   :  { %v1614_v35 = vpop.f32.mrb[24].mxu0  ;;  %v1616_v36 = vpop.f32.mrb[24].mxu1  ;;  %v577_v51 = vsel %vm576_vm1, %v1500_v30, %v575_v13  ;;  %v1665_v5 = vmul.f32 0.6931472, %v1135_v42  ;;  %1152 = vlog2.f32 %v858_v4  ;;  %v1676_v9 = vadd.f32 %v469_v59, %v452_v32 }
 0x10a   :  { %v1623_v41 = vpop.f32.mrb[25].mxu0  ;;  %v1625_v10 = vpop.f32.mrb[25].mxu1  ;;  %v696_v19 = vsel %vm695_vm3, %v1507_v34, %v694_v29  ;;  %v1663_v26 = vsel %vm578_vm2, %v579_v3, %v577_v51  ;;  %v859_v3 = vmax.f32 %v1654_v62, 1e-10  ;;  %v520_v51 = vmul.f32 %v1494_v25, %v1494_v25 }
 0x10b   :  { %v1634_v60 = vpop.f32.mrb[26].mxu0  ;;  %v1636_v61 = vpop.f32.mrb[26].mxu1  ;;  %v1669_v29 = vsel %vm697_vm4, %v698_v2, %v696_v19  ;;  %v453_v34 = vmul.f32 %v1502_v31, %v1502_v31  ;;  %1154 = vrsqrt.f32 %v1642_v27  ;;  %v504_v42 = vmul.f32 %v1504_v33, %v1504_v33 }
 0x10c   :  { %v1646_v8 = vpop.f32.mrb[27].mxu0  ;;  %v1648_v43 = vpop.f32.mrb[27].mxu1  ;;  %v470_v19 = vmul.f32 %v1513_v37, %v1513_v37  ;;  %v521_v4 = vmul.f32 %v1515_v44, %v1515_v44  ;;  %1156 = vrsqrt.f32 %v1654_v62  ;;  %v1703_v59 = vadd.f32 %v520_v51, %v503_v23 }
 0x10d   :  { %v1137_v56 = vpop.eup %1136  ;;  %v454_v33 = vmul.f32 %v1553_v24, %v1553_v24  ;;  %1158 = vlog2.f32 %v791_v52  ;;  %v505_v12 = vmul.f32 %v1555_v28, %v1555_v28  ;;  %v471_v20 = vmul.f32 %v1563_v40, %v1563_v40 }
 0x10e   :  { %v1139_v22 = vpop.eup %1138  ;;  %v1673_v6 = vmul.f32 0.6931472, %v1137_v56  ;;  %v1713_v17 = vadd.f32 %v470_v19, %v453_v34  ;;  %v1715_v13 = vadd.f32 %v521_v4, %v504_v42  ;;  %1160 = vlog2.f32 %v859_v3 }
 0x10f   :  { %v582_v30 = vmul.f32 %v1139_v22, %v1547_v63  ;;  %v1141_v16 = vpop.eup %1140  ;;  %v522_v52 = vmul.f32 %v1565_v7, %v1565_v7  ;;  %1162 = vrsqrt.f32 %v1676_v9  ;;  %v455_v28 = vmul.f32 %v1577_v46, %v1577_v46 }
 0x110   :  { %v1699_v31 = vpop.eup %1142  ;;  %v1724_v24 = vmul.f32 %v1141_v16, %v1549_v0  ;;  %v506_v16 = vmul.f32 %v1579_v11, %v1579_v11  ;;  %1164 = vrsqrt.f32 %v1703_v59  ;;  %v1741_v40 = vadd.f32 %v471_v20, %v454_v33 }
 0x111   :  { %v1684_v2 = vpop.f32.mrb[28].mxu0  ;;  %v1686_v1 = vpop.f32.mrb[28].mxu1  ;;  %v1733_v34 = vsel %vm583_vm5, %v1547_v63, %v582_v30  ;;  %v1743_v42 = vadd.f32 %v522_v52, %v505_v12  ;;  %v472_v7 = vmul.f32 %v1586_v18, %v1586_v18  ;;  %v523_v19 = vmul.f32 %v1596_v54, %v1596_v54 }
 0x112   :  { %v1695_v25 = vpop.f32.mrb[29].mxu0  ;;  %v1697_v32 = vpop.f32.mrb[29].mxu1  ;;  %v456_v46 = vmul.f32 %v1614_v35, %v1614_v35  ;;  %v507_v11 = vmul.f32 %v1616_v36, %v1616_v36  ;;  %v473_v20 = vmul.f32 %v1623_v41, %v1623_v41  ;;  %1166 = vrsqrt.f32 %v1713_v17 }
 0x113   :  { %v1707_v22 = vpop.f32.mrb[30].mxu0  ;;  %v1709_v37 = vpop.f32.mrb[30].mxu1  ;;  %v1759_v4 = vadd.f32 %v472_v7, %v455_v28  ;;  %v524_v18 = vmul.f32 %v1625_v10, %v1625_v10  ;;  %vm702_vm6 = vcmp.eq.f32.partialorder %v1549_v0, inf  ;;  %1168 = vrsqrt.f32 %v1741_v40 }
 0x114   :  { %v1711_v44 = vpop.eup %1144  ;;  %v1719_v56 = vpop.f32.mrb[31].mxu0  ;;  %v1768_v36 = vadd.f32 %v523_v19, %v506_v16  ;;  %v1770_v41 = vadd.f32 %v473_v20, %v456_v46  ;;  %vm590_vm7 = vcmp.eq.f32.partialorder %v1594_v53, inf  ;;  %vm597_vm8 = vcmp.eq.f32.partialorder %v1642_v27, inf }
 0x115   :  { %v1721_v23 = vpop.f32.mrb[31].mxu1  ;;  %v1147_v51 = vpop.eup %1146  ;;  %1170 = vrsqrt.f32 %v1759_v4  ;;  %v1775_v10 = vadd.f32 %v524_v18, %v507_v11  ;;  %v457_v7 = vmul.f32 %v1634_v60, %v1634_v60  ;;  %vm709_vm9 = vcmp.eq.f32.partialorder %v1600_v21, inf }
 0x116   :  { %v1149_v3 = vpop.eup %1148  ;;  %v589_v35 = vmul.f32 %v1147_v51, %v1594_v53  ;;  %v508_v51 = vmul.f32 %v1636_v61, %v1636_v61  ;;  %1172 = vrsqrt.f32 %v1715_v13  ;;  %v474_v20 = vmul.f32 %v1646_v8, %v1646_v8 }
 0x117   :  { %v1747_v30 = vpop.eup %1150  ;;  %v525_v11 = vmul.f32 %v1648_v43, %v1648_v43  ;;  %v458_v18 = vmul.f32 %v1684_v2, %v1684_v2  ;;  %vm585_vm10 = vcmp.eq.f32.partialorder %v1547_v63, 0.0  ;;  %1174 = vrsqrt.f32 %v1770_v41 }
 0x118   :  { %v1763_v52 = vpop.eup %1152  ;;  %v509_v61 = vmul.f32 %v1686_v1, %v1686_v1  ;;  %v526_v8 = vmul.f32 %v1697_v32, %v1697_v32  ;;  %vm592_vm11 = vcmp.eq.f32.partialorder %v1594_v53, 0.0  ;;  %1176 = vrsqrt.f32 %v1743_v42 }
 0x119   :  { %v246_v33 = vpop.f32.mrb[32].mxu0  ;;  %v437_v54 = vpop.f32.mrb[32].mxu1  ;;  %v1802_v2 = vadd.f32 %v474_v20, %v457_v7  ;;  %v459_v32 = vmul.f32 %v1707_v22, %v1707_v22  ;;  %v510_v39 = vmul.f32 %v1709_v37, %v1709_v37  ;;  %v476_v7 = vmul.f32 %v1719_v56, %v1719_v56 }
 0x11a   :  { %v248_v12 = vpop.f32.mrb[33].mxu0  ;;  %v439_v28 = vpop.f32.mrb[33].mxu1  ;;  %v1832_v56 = vsel %vm702_vm6, %v1549_v0, %v1724_v24  ;;  %vm599_vm12 = vcmp.eq.f32.partialorder %v1642_v27, 0.0  ;;  %vm604_vm13 = vcmp.eq.f32.partialorder %v1676_v9, inf  ;;  %vm606_vm14 = vcmp.eq.f32.partialorder %v1676_v9, 0.0 }
 0x11b   :  { %v250_v16 = vpop.f32.mrb[34].mxu0  ;;  %v441_v19 = vpop.f32.mrb[34].mxu1  ;;  %1178 = vrsqrt.f32 %v1802_v2  ;;  %v477_v22 = vmul.f32 %v248_v12, %v248_v12  ;;  %v1824_v37 = vadd.f32 %v476_v7, %v459_v32  ;;  %v2217_v7 = vand.u32 2147483648, %v1547_v63 }
 0x11c   :  { %v1155_v46 = vpop.eup %1154  ;;  %v251_v60 = vpop.f32.mrb[35].mxu0  ;;  %v475_v16 = vmul.f32 %v1695_v25, %v1695_v25  ;;  %v1804_v19 = vadd.f32 %v525_v11, %v508_v51  ;;  %v1810_v25 = vadd.f32 %v526_v8, %v509_v61  ;;  %v527_v51 = vmul.f32 %v1721_v23, %v1721_v23 }
 0x11d   :  { %v442_v55 = vpop.f32.mrb[35].mxu1  ;;  %v1157_v49 = vpop.eup %1156  ;;  %1180 = vrsqrt.f32 %v1768_v36  ;;  %v460_v11 = vmul.f32 %v246_v33, %v246_v33  ;;  %vm611_vm15 = vcmp.eq.f32.partialorder %v1713_v17, inf  ;;  %vm618_vm0 = vcmp.eq.f32.partialorder %v1741_v40, inf }
 0x11e   :  { %v1797_v43 = vpop.eup %1158  ;;  %v708_v55 = vmul.f32 %v1149_v3, %v1600_v21  ;;  %v1808_v1 = vadd.f32 %v475_v16, %v458_v18  ;;  %v596_v3 = vmul.f32 %v1155_v46, %v1642_v27  ;;  %v511_v18 = vmul.f32 %v437_v54, %v437_v54 }
 0x11f   :  { %v1806_v60 = vpop.eup %1160  ;;  %v1826_v61 = vadd.f32 %v527_v51, %v510_v39  ;;  %v528_v46 = vmul.f32 %v439_v28, %v439_v28  ;;  %v1836_v33 = vadd.f32 %v477_v22, %v460_v11  ;;  %v591_v39 = vsel %vm590_vm7, %v1594_v53, %v589_v35 }
 0x120   :  { %v1163_v38 = vpop.eup %1162  ;;  %1182 = vrsqrt.f32 %v1808_v1  ;;  %v598_v24 = vsel %vm597_vm8, %v1642_v27, %v596_v3  ;;  %v1853_v8 = vmul.f32 %v1157_v49, %v1654_v62  ;;  %v1866_v3 = vsel %vm585_vm10, %v2217_v7, %v1733_v34 }
 0x121   :  { %v1165_v20 = vpop.eup %1164  ;;  %v603_v23 = vmul.f32 %v1163_v38, %v1676_v9  ;;  %1184 = vrsqrt.f32 %v1775_v10  ;;  %v1842_v54 = vadd.f32 %v528_v46, %v511_v18  ;;  %v1850_v38 = vsel %vm709_vm9, %v1600_v21, %v708_v55 }
 0x122   :  { %v1167_v16 = vpop.eup %1166  ;;  %1186 = vrsqrt.f32 %v1804_v19  ;;  %v1856_v32 = vmul.f32 %v1165_v20, %v1703_v59  ;;  %v2218_v51 = vand.u32 2147483648, %v1594_v53  ;;  %v2219_v11 = vand.u32 2147483648, %v1642_v27 }
 0x123   :  { %v1169_v12 = vpop.eup %1168  ;;  %1188 = vrsqrt.f32 %v1810_v25  ;;  %v610_v49 = vmul.f32 %v1167_v16, %v1713_v17  ;;  %v605_v63 = vsel %vm604_vm13, %v1676_v9, %v603_v23  ;;  %vm704_vm1 = vcmp.eq.f32.partialorder %v1549_v0, 0.0 }
 0x124   :  { %v1171_v28 = vpop.eup %1170  ;;  %v1875_v20 = vsel %vm592_vm11, %v2218_v51, %v591_v39  ;;  %v1879_v18 = vsel %vm599_vm12, %v2219_v11, %v598_v24  ;;  %v617_v34 = vmul.f32 %v1169_v12, %v1741_v40  ;;  %vm711_vm2 = vcmp.eq.f32.partialorder %v1600_v21, 0.0 }
 0x125   :  { %v1859_v35 = vpop.eup %1172  ;;  %v624_v53 = vmul.f32 %v1171_v28, %v1759_v4  ;;  %vm716_vm3 = vcmp.eq.f32.partialorder %v1654_v62, inf  ;;  %v607_v27 = vand.u32 2147483648, %v1676_v9  ;;  %v612_v46 = vsel %vm611_vm15, %v1713_v17, %v610_v49 }
 0x126   :  { %v1175_v55 = vpop.eup %1174  ;;  %v619_v16 = vsel %vm618_vm0, %v1741_v40, %v617_v34  ;;  %vm625_vm4 = vcmp.eq.f32.partialorder %v1759_v4, inf  ;;  %v614_v12 = vand.u32 2147483648, %v1713_v17  ;;  %v621_v39 = vand.u32 2147483648, %v1741_v40 }
 0x127   :  { %v1883_v22 = vpop.eup %1176  ;;  %v626_v24 = vsel %vm625_vm4, %v1759_v4, %v624_v53  ;;  %v631_v28 = vmul.f32 %v1175_v55, %v1770_v41  ;;  %vm613_vm5 = vcmp.eq.f32.partialorder %v1713_v17, 0.0  ;;  %vm620_vm6 = vcmp.eq.f32.partialorder %v1741_v40, 0.0 }
 0x128   :  { %v1179_v23 = vpop.eup %1178  ;;  %v628_v49 = vand.u32 2147483648, %v1759_v4  ;;  %v1906_v34 = vsel %vm606_vm14, %v607_v27, %v605_v63  ;;  %v1908_v15 = vsel %vm613_vm5, %v614_v12, %v612_v46  ;;  %v1910_v14 = vsel %vm620_vm6, %v621_v39, %v619_v16 }
 0x129   :  { %v1181_v7 = vpop.eup %1180  ;;  %v638_v51 = vmul.f32 %v1179_v23, %v1802_v2  ;;  %vm627_vm7 = vcmp.eq.f32.partialorder %v1759_v4, 0.0  ;;  %vm632_vm8 = vcmp.eq.f32.partialorder %v1770_v41, inf  ;;  %vm639_vm9 = vcmp.eq.f32.partialorder %v1802_v2, inf }
 0x12a   :  { %v1183_v11 = vpop.eup %1182  ;;  %v1913_v53 = vsel %vm627_vm7, %v628_v49, %v626_v24  ;;  %v633_v50 = vsel %vm632_vm8, %v1770_v41, %v631_v28  ;;  %vm646_vm10 = vcmp.eq.f32.partialorder %v1808_v1, inf  ;;  %1190 = vrsqrt.f32 %v1824_v37 }
 0x12b   :  { %v1185_v55 = vpop.eup %1184  ;;  %v645_v23 = vmul.f32 %v1183_v11, %v1808_v1  ;;  %v640_v63 = vsel %vm639_vm9, %v1802_v2, %v638_v51  ;;  %v635_v46 = vand.u32 2147483648, %v1770_v41  ;;  %v642_v16 = vand.u32 2147483648, %v1802_v2 }
 0x12c   :  { %v1187_v45 = vpop.eup %1186  ;;  %v649_v39 = vand.u32 2147483648, %v1808_v1  ;;  %vm634_vm11 = vcmp.eq.f32.partialorder %v1770_v41, 0.0  ;;  %vm641_vm12 = vcmp.eq.f32.partialorder %v1802_v2, 0.0  ;;  %vm648_vm13 = vcmp.eq.f32.partialorder %v1808_v1, 0.0 }
 0x12d   :  { %v1189_v27 = vpop.eup %1188  ;;  %v647_v12 = vsel %vm646_vm10, %v1808_v1, %v645_v23  ;;  %1192 = vrsqrt.f32 %v1836_v33  ;;  %v1930_v24 = vsel %vm634_vm11, %v635_v46, %v633_v50  ;;  %v1932_v28 = vsel %vm641_vm12, %v642_v16, %v640_v63 }
 0x12e   :  { %v1934_v49 = vsel %vm648_vm13, %v649_v39, %v647_v12  ;;  %v656_v51 = vand.u32 2147483648, %v1824_v37  ;;  %vm653_vm14 = vcmp.eq.f32.partialorder %v1824_v37, inf  ;;  %v663_v11 = vand.u32 2147483648, %v1836_v33 }
 0x12f   :  { %v2220_v23 = vand.u32 2147483648, %v1549_v0  ;;  %v2221_v50 = vand.u32 2147483648, %v1600_v21  ;;  %v717_v46 = vsel %vm716_vm3, %v1654_v62, %v1853_v8  ;;  %vm718_vm15 = vcmp.eq.f32.partialorder %v1654_v62, 0.0 }
 0x130   :  { %vm723_vm0 = vcmp.eq.f32.partialorder %v1703_v59, inf  ;;  %vm725_vm4 = vcmp.eq.f32.partialorder %v1703_v59, 0.0  ;;  %v729_v0 = vmul.f32 %v1859_v35, %v1715_v13  ;;  %vm655_vm3 = vcmp.eq.f32.partialorder %v1824_v37, 0.0 }
 0x131   :  { %v1944_v47 = vsel %vm704_vm1, %v2220_v23, %v1832_v56  ;;  %v1951_v63 = vsel %vm711_vm2, %v2221_v50, %v1850_v38  ;;  %vm660_vm1 = vcmp.eq.f32.partialorder %v1836_v33, inf  ;;  %v724_v21 = vsel %vm723_vm0, %v1703_v59, %v1856_v32 }
 0x132   :  { %v726_v56 = vand.u32 2147483648, %v1703_v59  ;;  %vm730_vm2 = vcmp.eq.f32.partialorder %v1715_v13, inf  ;;  %v736_v38 = vmul.f32 %v1883_v22, %v1743_v42  ;;  %v2222_v8 = vand.u32 2147483648, %v1654_v62 }
 0x133   :  { %v731_v35 = vsel %vm730_vm2, %v1715_v13, %v729_v0  ;;  %v733_v12 = vand.u32 2147483648, %v1715_v13  ;;  %vm737_vm5 = vcmp.eq.f32.partialorder %v1743_v42, inf  ;;  %vm662_vm6 = vcmp.eq.f32.partialorder %v1836_v33, 0.0 }
 0x134   :  { %v1972_v16 = vsel %vm718_vm15, %v2222_v8, %v717_v46  ;;  %vm732_vm7 = vcmp.eq.f32.partialorder %v1715_v13, 0.0  ;;  %v738_v32 = vsel %vm737_vm5, %v1743_v42, %v736_v38  ;;  %v740_v22 = vand.u32 2147483648, %v1743_v42  ;;  %v1191_v46 = vpop.eup %1190 }
 0x135   :  { %v743_v39 = vmul.f32 %v1181_v7, %v1768_v36  ;;  %v1984_v62 = vsel %vm725_vm4, %v726_v56, %v724_v21  ;;  %v1986_v23 = vsel %vm732_vm7, %v733_v12, %v731_v35  ;;  %vm739_vm8 = vcmp.eq.f32.partialorder %v1743_v42, 0.0 }
 0x136   :  { %v750_v50 = vmul.f32 %v1185_v55, %v1775_v10  ;;  %v1990_v0 = vsel %vm739_vm8, %v740_v22, %v738_v32  ;;  %vm744_vm9 = vcmp.eq.f32.partialorder %v1768_v36, inf  ;;  %vm746_vm10 = vcmp.eq.f32.partialorder %v1768_v36, 0.0 }
 0x137   :  { %v747_v38 = vand.u32 2147483648, %v1768_v36  ;;  %v652_v7 = vmul.f32 %v1191_v46, %v1824_v37  ;;  %v745_v21 = vsel %vm744_vm9, %v1768_v36, %v743_v39  ;;  %vm751_vm11 = vcmp.eq.f32.partialorder %v1775_v10, inf  ;;  %v1193_v8 = vpop.eup %1192 }
 0x138   :  { %v757_v56 = vmul.f32 %v1187_v45, %v1804_v19  ;;  %v752_v55 = vsel %vm751_vm11, %v1775_v10, %v750_v50  ;;  %vm753_vm12 = vcmp.eq.f32.partialorder %v1775_v10, 0.0  ;;  %v754_v35 = vand.u32 2147483648, %v1775_v10 }
 0x139   :  { %vm758_vm13 = vcmp.eq.f32.partialorder %v1804_v19, inf  ;;  %v654_v12 = vsel %vm653_vm14, %v1824_v37, %v652_v7  ;;  %v659_v32 = vmul.f32 %v1193_v8, %v1836_v33  ;;  %v764_v39 = vmul.f32 %v1189_v27, %v1810_v25 }
 0x13a   :  { %v759_v22 = vsel %vm758_vm13, %v1804_v19, %v757_v56  ;;  %v2009_v45 = vsel %vm746_vm10, %v747_v38, %v745_v21  ;;  %vm760_vm15 = vcmp.eq.f32.partialorder %v1804_v19, 0.0  ;;  %v761_v50 = vand.u32 2147483648, %v1804_v19 }
 0x13b   :  { %vm765_vm0 = vcmp.eq.f32.partialorder %v1810_v25, inf  ;;  %v661_v46 = vsel %vm660_vm1, %v1836_v33, %v659_v32  ;;  %v768_v8 = vand.u32 2147483648, %v1810_v25  ;;  %1194 = vrsqrt.f32 %v1826_v61 }
 0x13c   :  { %v766_v7 = vsel %vm765_vm0, %v1810_v25, %v764_v39  ;;  %v2022_v27 = vsel %vm655_vm3, %v656_v51, %v654_v12  ;;  %v2026_v38 = vsel %vm753_vm12, %v754_v35, %v752_v55  ;;  %v2028_v21 = vsel %vm760_vm15, %v761_v50, %v759_v22 }
 0x13d   :  { %vm767_vm14 = vcmp.eq.f32.partialorder %v1810_v25, 0.0  ;;  %v2033_v56 = vsel %vm662_vm6, %v663_v11, %v661_v46  ;;  %v775_v39 = vand.u32 2147483648, %v1826_v61  ;;  %1196 = vrsqrt.f32 %v1842_v54 }
 0x13e   :  { %v2035_v32 = vsel %vm767_vm14, %v768_v8, %v766_v7  ;;  %v782_v51 = vand.u32 2147483648, %v1842_v54  ;;  %v792_v12 = vmax.f32 %v1676_v9, 1e-10  ;;  %v793_v55 = vmax.f32 %v1713_v17, 1e-10 }
 0x13f   :  { %v924_v35 = vsub.f32 %v1663_v26, %v1669_v29  ;;  %vm772_vm4 = vcmp.eq.f32.partialorder %v1826_v61, inf  ;;  %v794_v11 = vmax.f32 %v1741_v40, 1e-10  ;;  %v795_v22 = vmax.f32 %v1759_v4, 1e-10 }
 0x140   :  { %v796_v50 = vmax.f32 %v1770_v41, 1e-10  ;;  %v925_v46 = vsub.f32 %v1866_v3, %v1944_v47  ;;  %vm774_vm1 = vcmp.eq.f32.partialorder %v1826_v61, 0.0  ;;  %v797_v9 = vmax.f32 %v1802_v2, 1e-10 }
 0x141   :  { %v798_v17 = vmax.f32 %v1808_v1, 1e-10  ;;  %v799_v7 = vmax.f32 %v1824_v37, 1e-10  ;;  %1198 = vlog2.f32 %v792_v12  ;;  %vm779_vm2 = vcmp.eq.f32.partialorder %v1842_v54, inf }
 0x142   :  { %v800_v40 = vmax.f32 %v1836_v33, 1e-10  ;;  %v812_v4 = vmul.f32 0.6931472, %v1699_v31  ;;  %v814_v41 = vmul.f32 0.6931472, %v1747_v30  ;;  %1200 = vlog2.f32 %v793_v55 }
 0x143   :  { %vm781_vm3 = vcmp.eq.f32.partialorder %v1842_v54, 0.0  ;;  %v816_v8 = vmul.f32 0.6931472, %v1797_v43  ;;  %1202 = vlog2.f32 %v794_v11  ;;  %v2061_v2 = vmul.f32 0.4342945, %v1665_v5 }
 0x144   :  { %v860_v1 = vmax.f32 %v1703_v59, 1e-10  ;;  %1204 = vlog2.f32 %v795_v22  ;;  %v2064_v37 = vmul.f32 0.4342945, %v812_v4  ;;  %v2066_v12 = vmul.f32 0.4342945, %v814_v41 }
 0x145   :  { %v861_v31 = vmax.f32 %v1715_v13, 1e-10  ;;  %1206 = vlog2.f32 %v796_v50  ;;  %v2069_v30 = vmul.f32 0.4342945, %v816_v8  ;;  %v862_v33 = vmax.f32 %v1743_v42, 1e-10  ;;  %v1195_v55 = vpop.eup %1194 }
 0x146   :  { %v863_v43 = vmax.f32 %v1768_v36, 1e-10  ;;  %1208 = vlog2.f32 %v797_v9  ;;  %v864_v5 = vmax.f32 %v1775_v10, 1e-10  ;;  %v865_v59 = vmax.f32 %v1804_v19, 1e-10 }
 0x147   :  { %v866_v11 = vmax.f32 %v1810_v25, 1e-10  ;;  %v771_v22 = vmul.f32 %v1195_v55, %v1826_v61  ;;  %1210 = vlog2.f32 %v798_v17  ;;  %v867_v13 = vmax.f32 %v1826_v61, 1e-10  ;;  %v1197_v4 = vpop.eup %1196 }
 0x148   :  { %v868_v50 = vmax.f32 %v1842_v54, 1e-10  ;;  %1212 = vlog2.f32 %v799_v7  ;;  %v880_v42 = vmul.f32 0.6931472, %v1711_v44  ;;  %v882_v36 = vmul.f32 0.6931472, %v1763_v52 }
 0x149   :  { %v884_v9 = vmul.f32 0.6931472, %v1806_v60  ;;  %v773_v10 = vsel %vm772_vm4, %v1826_v61, %v771_v22  ;;  %v778_v19 = vmul.f32 %v1197_v4, %v1842_v54  ;;  %1214 = vlog2.f32 %v800_v40 }
 0x14a   :  { %v2087_v25 = vmul.f32 0.4342945, %v1673_v6  ;;  %v2091_v17 = vsel %vm774_vm1, %v775_v39, %v773_v10  ;;  %1216 = vlog2.f32 %v860_v1  ;;  %v2093_v44 = vmul.f32 0.4342945, %v880_v42 }
 0x14b   :  { %v2095_v52 = vmul.f32 0.4342945, %v882_v36  ;;  %v1199_v60 = vpop.eup %1198  ;;  %v780_v7 = vsel %vm779_vm2, %v1842_v54, %v778_v19  ;;  %1218 = vlog2.f32 %v861_v31  ;;  %v2100_v41 = vmul.f32 0.4342945, %v884_v9 }
 0x14c   :  { %v926_v6 = vsub.f32 %v1875_v20, %v1951_v63  ;;  %v1201_v40 = vpop.eup %1200  ;;  %v2106_v61 = vsel %vm781_vm3, %v782_v51, %v780_v7  ;;  %v818_v39 = vmul.f32 0.6931472, %v1199_v60  ;;  %1220 = vlog2.f32 %v862_v33 }
 0x14d   :  { %v927_v8 = vsub.f32 %v1879_v18, %v1972_v16  ;;  %v1203_v1 = vpop.eup %1202  ;;  %v820_v55 = vmul.f32 0.6931472, %v1201_v40  ;;  %1222 = vlog2.f32 %v863_v43  ;;  %v928_v31 = vsub.f32 %v1906_v34, %v1984_v62 }
 0x14e   :  { %v929_v22 = vsub.f32 %v1908_v15, %v1986_v23  ;;  %v1205_v20 = vpop.eup %1204  ;;  %v822_v63 = vmul.f32 0.6931472, %v1203_v1  ;;  %v2114_v4 = vmul.f32 0.4342945, %v818_v39  ;;  %1224 = vlog2.f32 %v864_v5 }
 0x14f   :  { %v930_v54 = vsub.f32 %v1910_v14, %v1990_v0  ;;  %v1207_v51 = vpop.eup %1206  ;;  %v824_v33 = vmul.f32 0.6931472, %v1205_v20  ;;  %v2118_v18 = vmul.f32 0.4342945, %v820_v55  ;;  %1226 = vlog2.f32 %v865_v59 }
 0x150   :  { %v931_v16 = vsub.f32 %v1913_v53, %v2009_v45  ;;  %v1209_v34 = vpop.eup %1208  ;;  %v826_v62 = vmul.f32 0.6931472, %v1207_v51  ;;  %v2122_v43 = vmul.f32 0.4342945, %v822_v63  ;;  %1228 = vlog2.f32 %v866_v11 }
 0x151   :  { %v932_v42 = vsub.f32 %v1930_v24, %v2026_v38  ;;  %v1211_v5 = vpop.eup %1210  ;;  %v828_v36 = vmul.f32 0.6931472, %v1209_v34  ;;  %v2126_v9 = vmul.f32 0.4342945, %v824_v33  ;;  %1230 = vlog2.f32 %v867_v13 }
 0x152   :  { %v933_v10 = vsub.f32 %v1932_v28, %v2028_v21  ;;  %v1213_v59 = vpop.eup %1212  ;;  %v830_v19 = vmul.f32 0.6931472, %v1211_v5  ;;  %v2130_v60 = vmul.f32 0.4342945, %v826_v62  ;;  %1232 = vlog2.f32 %v868_v50 }
 0x153   :  { %v934_v7 = vsub.f32 %v1934_v49, %v2035_v32  ;;  %v1215_v11 = vpop.eup %1214  ;;  %v832_v40 = vmul.f32 0.6931472, %v1213_v59  ;;  %v2134_v39 = vmul.f32 0.4342945, %v828_v36  ;;  %v935_v24 = vsub.f32 %v2022_v27, %v2091_v17  ;;  %v2224_v49 = vld [vmem:[#allocation6_spill] sm:$0xff]  ;;  %v2226_v17 = vld [vmem:[#allocation8_spill] sm:$0xff] }
 0x154   :  { %v936_v38 = vsub.f32 %v2033_v56, %v2106_v61  ;;  %v1217_v13 = vpop.eup %1216  ;;  %v834_v28 = vmul.f32 0.6931472, %v1215_v11  ;;  %v2140_v21 = vmul.f32 0.4342945, %v830_v19  ;;  %v2223_v50 = vsub.f32 %v1519_v48, %v1537_v58  ;;  %v2225_v56 = vld [vmem:[#allocation9_spill] sm:$0xff] }
 0x155   :  { %v956_v32 = vsub.f32 %v2224_v49, %v1583_v57  ;;  %v1219_v55 = vpop.eup %1218  ;;  %v2149_v20 = vmul.f32 0.4342945, %v832_v40  ;;  %v886_v63 = vmul.f32 0.6931472, %v1217_v13  ;;  %v2154_v27 = vand.u32 2147483647, %v924_v35 }
 0x156   :  { %v2145_v1 = vand.u32 2147483647, %v2223_v50  ;;  %v957_v61 = vsub.f32 %v2226_v17, %v2225_v56  ;;  %v1221_v51 = vpop.eup %1220  ;;  %v2158_v33 = vmul.f32 0.4342945, %v834_v28  ;;  %v888_v48 = vmul.f32 0.6931472, %v1219_v55 }
 0x157   :  { %v2163_v58 = vand.u32 2147483647, %v925_v46  ;;  %v958_v57 = vsub.f32 %v2061_v2, %v2087_v25  ;;  %v1223_v34 = vpop.eup %1222  ;;  %v890_v62 = vmul.f32 0.6931472, %v1221_v51  ;;  %v911_v26 = vmul.f32 0.4342945, %v886_v63 }
 0x158   :  { %v2167_v29 = vand.u32 2147483647, %v926_v6  ;;  %v959_v35 = vsub.f32 %v2064_v37, %v2093_v44  ;;  %v1225_v5 = vpop.eup %1224  ;;  %v892_v36 = vmul.f32 0.6931472, %v1223_v34  ;;  %v912_v59 = vmul.f32 0.4342945, %v888_v48 }
 0x159   :  { %v944_v19 = vand.u32 2147483647, %v927_v8  ;;  %v960_v47 = vsub.f32 %v2066_v12, %v2095_v52  ;;  %v1227_v3 = vpop.eup %1226  ;;  %v894_v46 = vmul.f32 0.6931472, %v1225_v5  ;;  %v913_v11 = vmul.f32 0.4342945, %v890_v62 }
 0x15a   :  { %v945_v40 = vand.u32 2147483647, %v928_v31  ;;  %v961_v2 = vsub.f32 %v2069_v30, %v2100_v41  ;;  %v1229_v25 = vpop.eup %1228  ;;  %v896_v6 = vmul.f32 0.6931472, %v1227_v3  ;;  %v914_v13 = vmul.f32 0.4342945, %v892_v36 }
 0x15b   :  { %v946_v37 = vand.u32 2147483647, %v929_v22  ;;  %v962_v44 = vsub.f32 %v2114_v4, %v911_v26  ;;  %v1231_v8 = vpop.eup %1230  ;;  %v898_v28 = vmul.f32 0.6931472, %v1229_v25  ;;  %v915_v50 = vmul.f32 0.4342945, %v894_v46 }
 0x15c   :  { %v947_v12 = vand.u32 2147483647, %v930_v54  ;;  %v963_v52 = vsub.f32 %v2118_v18, %v912_v59  ;;  %v1233_v31 = vpop.eup %1232  ;;  %v900_v30 = vmul.f32 0.6931472, %v1231_v8  ;;  %v916_v41 = vmul.f32 0.4342945, %v896_v6 }
 0x15d   :  { %v948_v49 = vand.u32 2147483647, %v931_v16  ;;  %v964_v15 = vsub.f32 %v2122_v43, %v913_v11  ;;  %v902_v23 = vmul.f32 0.6931472, %v1233_v31  ;;  %v917_v22 = vmul.f32 0.4342945, %v898_v28 }
 0x15e   :  { %v949_v4 = vand.u32 2147483647, %v932_v42  ;;  %v965_v55 = vsub.f32 %v2126_v9, %v914_v13  ;;  %v918_v63 = vmul.f32 0.4342945, %v900_v30  ;;  %v950_v56 = vand.u32 2147483647, %v933_v10 }
 0x15f   :  { %v951_v14 = vand.u32 2147483647, %v934_v7  ;;  %v966_v0 = vsub.f32 %v2130_v60, %v915_v50  ;;  %v919_v54 = vmul.f32 0.4342945, %v902_v23  ;;  %v952_v18 = vand.u32 2147483647, %v935_v24 }
 0x160   :  { %v953_v17 = vand.u32 2147483647, %v936_v38  ;;  %v967_v51 = vsub.f32 %v2134_v39, %v916_v41  ;;  %v968_v53 = vsub.f32 %v2140_v21, %v917_v22  ;;  %v969_v45 = vsub.f32 %v2149_v20, %v918_v63  ;;  %v2227_v60 = vld [vmem:[#allocation2_spill] sm:$0xff]  ;;  %v2228_v26 = vld [vmem:[#allocation3_spill] sm:$0xff]  ;;  %v2229_v36 = vld [vmem:[#allocation4_spill] sm:$0xff] }
 0x161   :  { %v973_v16 = vand.u32 2147483647, %v956_v32  ;;  %v974_v43 = vand.u32 2147483647, %v957_v61  ;;  %v970_v42 = vsub.f32 %v2158_v33, %v919_v54  ;;  %v975_v48 = vand.u32 2147483647, %v958_v57 }
 0x162   :  { %v976_v9 = vand.u32 2147483647, %v959_v35  ;;  %v977_v34 = vand.u32 2147483647, %v960_v47  ;;  %v978_v10 = vand.u32 2147483647, %v961_v2  ;;  %v988_v24 = vadd.f32 %v2228_v26, %v2227_v60 }
 0x163   :  { %v979_v7 = vand.u32 2147483647, %v962_v44  ;;  %v980_v62 = vand.u32 2147483647, %v963_v52  ;;  %v981_v38 = vand.u32 2147483647, %v964_v15  ;;  %v991_v35 = vadd.f32 %v974_v43, %v2145_v1 }
 0x164   :  { %v982_v5 = vand.u32 2147483647, %v965_v55  ;;  %v983_v39 = vand.u32 2147483647, %v966_v0  ;;  %v2230_v21 = vld [vmem:[#allocation5_spill] sm:$0xff]  ;;  %v2231_v3 = vld [vmem:[#allocation7_spill] sm:$0xff]  ;;  %v992_v47 = vadd.f32 %v975_v48, %v2154_v27  ;;  %v993_v46 = vadd.f32 %v976_v9, %v2163_v58 }
 0x165   :  { %v989_v59 = vadd.f32 %v2230_v21, %v2229_v36  ;;  %v984_v20 = vand.u32 2147483647, %v967_v51  ;;  %v985_v32 = vand.u32 2147483647, %v968_v53  ;;  %v986_v61 = vand.u32 2147483647, %v969_v45 }
 0x166   :  { %v990_v33 = vadd.f32 %v973_v16, %v2231_v3  ;;  %v987_v57 = vand.u32 2147483647, %v970_v42  ;;  %v994_v11 = vadd.f32 %v977_v34, %v2167_v29  ;;  %v995_v2 = vadd.f32 %v978_v10, %v944_v19 }
 0x167   :  { %v996_v25 = vadd.f32 %v979_v7, %v945_v40  ;;  %v997_v6 = vadd.f32 %v980_v62, %v946_v37  ;;  %v998_v13 = vadd.f32 %v981_v38, %v947_v12  ;;  %v999_v44 = vadd.f32 %v982_v5, %v948_v49 }
 0x168   :  { %v1000_v8 = vadd.f32 %v983_v39, %v949_v4  ;;  %v1001_v28 = vadd.f32 %v984_v20, %v950_v56  ;;  %v1002_v50 = vadd.f32 %v985_v32, %v951_v14  ;;  %v1003_v52 = vadd.f32 %v986_v61, %v952_v18 }
 0x169   :  { %v1004_v31 = vadd.f32 %v987_v57, %v953_v17  ;;  %v1005_v30 = vadd.f32 %v989_v59, %v988_v24 }
 0x16b   :  { %v1006_v41 = vadd.f32 %v1005_v30, %v990_v33 }
 0x16d   :  { %v1007_v15 = vadd.f32 %v1006_v41, %v991_v35 }
 0x16f   :  { %v1008_v1 = vadd.f32 %v1007_v15, %v992_v47 }
 0x171   :  { %v1009_v23 = vadd.f32 %v1008_v1, %v993_v46 }
 0x173   :  { %v1010_v27 = vadd.f32 %v1009_v23, %v994_v11 }
 0x175   :  { %v1011_v22 = vadd.f32 %v1010_v27, %v995_v2 }
 0x177   :  { %v1012_v58 = vadd.f32 %v1011_v22, %v996_v25 }
 0x179   :  { %v1013_v55 = vadd.f32 %v1012_v58, %v997_v6 }
 0x17b   :  { %v1014_v29 = vadd.f32 %v1013_v55, %v998_v13 }
 0x17d   :  { %v1015_v19 = vadd.f32 %v1014_v29, %v999_v44 }
 0x17f   :  { %v1016_v40 = vadd.f32 %v1015_v19, %v1000_v8 }
 0x181   :  { %v1017_v37 = vadd.f32 %v1016_v40, %v1001_v28 }
 0x183   :  { %v1018_v12 = vadd.f32 %v1017_v37, %v1002_v50 }
 0x185   :  { %v1019_v49 = vadd.f32 %v1018_v12, %v1003_v52 }
 0x187   :  { %v1020_v4 = vadd.f32 %v1019_v49, %v1004_v31 }
 0x189   :  { %1021 = vadd.xlane.f32.xlu0 %v1020_v4 }
 0x216   :  { %v1022_v63 = vpop.xlane.xlu0 %1021 }
 0x217   :  { %v1023_v56 = vrot.slane %v1022_v63, 4 }
 0x219   :  { %v1024_v14 = vadd.f32 %v1023_v56, %v1022_v63 }
 0x21b   :  { %v1025_v0 = vrot.slane %v1024_v14, 2 }
 0x21d   :  { %v1026_v54 = vadd.f32 %v1025_v0, %v1024_v14 }
 0x21f   :  { %v1027_v18 = vrot.slane %v1026_v54, 1 }
 0x221   :  { %v1028_v17 = vadd.f32 %v1027_v18, %v1026_v54 }
 0x223   :  { %1074 = vpush %v1028_v17 }
 0x254   :  { %s1075_s0 = spop %1074 }
 0x255   :  { %v1030_v51 = vstv %s1075_s0 }
 0x256   :  { %1031 = vst [vmem:[%s2208_s3] sm:$0xff] %v1030_v51 }

// kernel: multi_scale_stft_loss.2
= control target key start
LH: loop header
LB: loop body
LE: loop exit
PB: predicated region body
PF: predicated region fallthrough
CT: control target
= control target key end

     0   :  { %v505_v1 = vmov 0   ;;  %vm86_vm0 = vcmask 523264   ;;  %s715_s2 = inlined_call_operand.vmem [shape: bf16[64,256], index: 2, kind: input, shape index: {}]   ;;  %s716_s0 = inlined_call_operand.vmem [shape: bf16[40,64], index: 0, kind: input, shape index: {}]   ;;  %s717_s1 = inlined_call_operand.vmem [shape: bf16[40,64], index: 1, kind: input, shape index: {}]   ;;  %s718_s3 = inlined_call_operand.vmem [shape: f32[1,8,128], index: 3, kind: output, shape index: {}]  }
   0x1   :  { %v447_v0 = vld [vmem:[%s715_s2 + $0x4] ss:$8 sps:$4 sm:$0xff]   ;;  %128 = vmatprep.mubr.bf16.mxu0 %v505_v1  ;;  %211 = vmatprep.mubr.bf16.mxu1 %v505_v1  ;;  %v449_v2 = vld [vmem:[%s715_s2] ss:$8 sps:$4 sm:$0xff]   ;;  %v450_v3 = vld [vmem:[%s715_s2 + $0x14] ss:$8 sps:$4 sm:$0xff]  }
   0x2   :  { %96 = vmatprep.subr.bf16.mxu0 %v447_v0  ;;  %179 = vmatprep.subr.bf16.mxu1 %v447_v0  ;;  %v452_v4 = vld [vmem:[%s715_s2 + $0x10] ss:$8 sps:$4 sm:$0xff]   ;;  %v453_v5 = vld [vmem:[%s715_s2 + $0x24] ss:$8 sps:$4 sm:$0xff]   ;;  %v455_v6 = vld [vmem:[%s715_s2 + $0x20] ss:$8 sps:$4 sm:$0xff]  }
   0x3   :  { %97 = vmatpush1.bf16.msra.mxu0 %v449_v2  ;;  %180 = vmatpush1.bf16.msra.mxu1 %v449_v2  ;;  %v456_v7 = vld [vmem:[%s715_s2 + $0x34] ss:$8 sps:$4 sm:$0xff]   ;;  %v458_v8 = vld [vmem:[%s715_s2 + $0x30] ss:$8 sps:$4 sm:$0xff]   ;;  %v459_v9 = vld [vmem:[%s716_s0] sm:$0xff]  }
   0x4   :  { %98 = vmatprep.subr.bf16.mxu0 %v450_v3  ;;  %181 = vmatprep.subr.bf16.mxu1 %v450_v3  ;;  %v460_v10 = vld [vmem:[%s717_s1] sm:$0xff]   ;;  %v461_v11 = vld [vmem:[%s716_s0 + $0x8] sm:$0xff]   ;;  %v463_v13 = vld [vmem:[%s716_s0 + $0x10] ss:$0 sps:$4 sm:$0xff]  }
   0x5   :  { %v462_v12 = vld [vmem:[%s717_s1 + $0x8] sm:$0xff]   ;;  %v464_v14 = vld [vmem:[%s717_s1 + $0x10] ss:$0 sps:$4 sm:$0xff]  }
   0x7   :  { %99 = vmatpush1.bf16.msra.mxu0 %v452_v4  ;;  %182 = vmatpush1.bf16.msra.mxu1 %v452_v4 }
   0x8   :  { %100 = vmatprep.subr.bf16.mxu0 %v453_v5  ;;  %183 = vmatprep.subr.bf16.mxu1 %v453_v5 }
   0xb   :  { %101 = vmatpush1.bf16.msra.mxu0 %v455_v6  ;;  %184 = vmatpush1.bf16.msra.mxu1 %v455_v6 }
   0xc   :  { %102 = vmatprep.subr.bf16.mxu0 %v456_v7  ;;  %185 = vmatprep.subr.bf16.mxu1 %v456_v7 }
   0xf   :  { %103 = vmatpush1.bf16.msra.mxu0 %v458_v8  ;;  %186 = vmatpush1.bf16.msra.mxu1 %v458_v8 }
  0x12   :  { %435 = vmatmul.mubr.msk.bf16.vlgmr.msra.gmra.mrb[0].mxu0 %vm86_vm0, %v459_v9  ;;  %441 = vmatmul.mubr.msk.bf16.vlgmr.msra.gmra.mrb[0].mxu1 %vm86_vm0, %v460_v10 }
  0x13   :  { %138 = vmatprep.mubr.bf16.mxu0 %v505_v1  ;;  %221 = vmatprep.mubr.bf16.mxu1 %v505_v1 }
  0x1a   :  { %436 = vmatmul.mubr.msk.bf16.gmra.mrb[4].mxu0 %vm86_vm0, %v461_v11  ;;  %442 = vmatmul.mubr.msk.bf16.gmra.mrb[4].mxu1 %vm86_vm0, %v462_v12 }
  0x1b   :  { %148 = vmatprep.mubr.bf16.mxu0 %v505_v1  ;;  %231 = vmatprep.mubr.bf16.mxu1 %v505_v1 }
  0x22   :  { %437 = vmatmul.mubr.msk.bf16.gmra.mrb[8].mxu0 %vm86_vm0, %v463_v13  ;;  %443 = vmatmul.mubr.msk.bf16.gmra.mrb[8].mxu1 %vm86_vm0, %v464_v14 }
  0xe5   :  { %v130_v15 = vpop.f32.mrb[0].mxu0  ;;  %v213_v16 = vpop.f32.mrb[0].mxu1 }
  0xe6   :  { %v240_v17 = vmul.f32 %v130_v15, %v130_v15  ;;  %v255_v18 = vmul.f32 %v213_v16, %v213_v16  ;;  %v132_v19 = vpop.f32.mrb[1].mxu0  ;;  %v215_v20 = vpop.f32.mrb[1].mxu1 }
  0xe7   :  { %v245_v21 = vmul.f32 %v132_v19, %v132_v19  ;;  %v260_v22 = vmul.f32 %v215_v20, %v215_v20  ;;  %v134_v23 = vpop.f32.mrb[2].mxu0  ;;  %v217_v24 = vpop.f32.mrb[2].mxu1 }
  0xe8   :  { %v241_v25 = vmul.f32 %v134_v23, %v134_v23  ;;  %v256_v26 = vmul.f32 %v217_v24, %v217_v24  ;;  %v136_v27 = vpop.f32.mrb[3].mxu0  ;;  %v219_v28 = vpop.f32.mrb[3].mxu1 }
  0xe9   :  { %v568_v29 = vadd.f32 %v245_v21, %v240_v17  ;;  %v570_v30 = vadd.f32 %v260_v22, %v255_v18  ;;  %v246_v31 = vmul.f32 %v136_v27, %v136_v27  ;;  %v261_v32 = vmul.f32 %v219_v28, %v219_v28 }
  0xeb   :  { %465 = vrsqrt.f32 %v568_v29  ;;  %v573_v33 = vadd.f32 %v246_v31, %v241_v25  ;;  %v575_v34 = vadd.f32 %v261_v32, %v256_v26  ;;  %vm272_vm1 = vcmp.eq.f32.partialorder %v568_v29, inf }
  0xec   :  { %467 = vrsqrt.f32 %v570_v30  ;;  %v275_v53 = vand.u32 2147483648, %v568_v29  ;;  %vm307_vm2 = vcmp.eq.f32.partialorder %v570_v30, inf  ;;  %vm274_vm4 = vcmp.eq.f32.partialorder %v568_v29, 0.0 }
  0xed   :  { %469 = vrsqrt.f32 %v573_v33  ;;  %v140_v35 = vpop.f32.mrb[4].mxu0  ;;  %v223_v36 = vpop.f32.mrb[4].mxu1  ;;  %vm279_vm3 = vcmp.eq.f32.partialorder %v573_v33, inf  ;;  %vm281_vm5 = vcmp.eq.f32.partialorder %v573_v33, 0.0  ;;  %v282_v56 = vand.u32 2147483648, %v573_v33 }
  0xee   :  { %471 = vrsqrt.f32 %v575_v34  ;;  %v242_v37 = vmul.f32 %v140_v35, %v140_v35  ;;  %v257_v38 = vmul.f32 %v223_v36, %v223_v36  ;;  %v142_v39 = vpop.f32.mrb[5].mxu0  ;;  %v225_v40 = vpop.f32.mrb[5].mxu1  ;;  %vm309_vm6 = vcmp.eq.f32.partialorder %v570_v30, 0.0 }
  0xef   :  { %v247_v41 = vmul.f32 %v142_v39, %v142_v39  ;;  %v262_v42 = vmul.f32 %v225_v40, %v225_v40  ;;  %v144_v43 = vpop.f32.mrb[6].mxu0  ;;  %v227_v44 = vpop.f32.mrb[6].mxu1  ;;  %v310_v57 = vand.u32 2147483648, %v570_v30  ;;  %vm314_vm7 = vcmp.eq.f32.partialorder %v575_v34, inf }
  0xf0   :  { %v243_v45 = vmul.f32 %v144_v43, %v144_v43  ;;  %v258_v46 = vmul.f32 %v227_v44, %v227_v44  ;;  %v146_v47 = vpop.f32.mrb[7].mxu0  ;;  %v229_v48 = vpop.f32.mrb[7].mxu1  ;;  %v317_v61 = vand.u32 2147483648, %v575_v34  ;;  %v340_v62 = vmax.f32 %v568_v29, 1e-10 }
  0xf1   :  { %v580_v49 = vadd.f32 %v247_v41, %v242_v37  ;;  %v582_v50 = vadd.f32 %v262_v42, %v257_v38  ;;  %v248_v51 = vmul.f32 %v146_v47, %v146_v47  ;;  %v263_v52 = vmul.f32 %v229_v48, %v229_v48 }
  0xf2   :  { %vm316_vm8 = vcmp.eq.f32.partialorder %v575_v34, 0.0  ;;  %v341_v5 = vmax.f32 %v573_v33, 1e-10  ;;  %v360_v12 = vmax.f32 %v570_v30, 1e-10 }
  0xf3   :  { %473 = vrsqrt.f32 %v580_v49  ;;  %v588_v54 = vadd.f32 %v248_v51, %v243_v45  ;;  %v590_v55 = vadd.f32 %v263_v52, %v258_v46  ;;  %vm286_vm9 = vcmp.eq.f32.partialorder %v580_v49, inf }
  0xf4   :  { %475 = vrsqrt.f32 %v582_v50  ;;  %vm288_vm10 = vcmp.eq.f32.partialorder %v580_v49, 0.0  ;;  %v289_v19 = vand.u32 2147483648, %v580_v49  ;;  %vm321_vm11 = vcmp.eq.f32.partialorder %v582_v50, inf }
  0xf5   :  { %v466_v58 = vpop.eup %465  ;;  %v150_v59 = vpop.f32.mrb[8].mxu0  ;;  %477 = vrsqrt.f32 %v588_v54  ;;  %vm293_vm12 = vcmp.eq.f32.partialorder %v588_v54, inf  ;;  %vm295_vm13 = vcmp.eq.f32.partialorder %v588_v54, 0.0  ;;  %v296_v24 = vand.u32 2147483648, %v588_v54 }
  0xf6   :  { %v233_v60 = vpop.f32.mrb[8].mxu1  ;;  %v468_v63 = vpop.eup %467  ;;  %v244_v0 = vmul.f32 %v150_v59, %v150_v59  ;;  %v271_v4 = vmul.f32 %v466_v58, %v568_v29  ;;  %479 = vrsqrt.f32 %v590_v55  ;;  %vm323_vm14 = vcmp.eq.f32.partialorder %v582_v50, 0.0 }
  0xf7   :  { %v259_v1 = vmul.f32 %v233_v60, %v233_v60  ;;  %v152_v2 = vpop.f32.mrb[9].mxu0  ;;  %v235_v3 = vpop.f32.mrb[9].mxu1  ;;  %v306_v11 = vmul.f32 %v468_v63, %v570_v30  ;;  %v324_v26 = vand.u32 2147483648, %v582_v50  ;;  %vm328_vm15 = vcmp.eq.f32.partialorder %v590_v55, inf }
  0xf8   :  { %v470_v6 = vpop.eup %469  ;;  %v249_v7 = vmul.f32 %v152_v2, %v152_v2  ;;  %v264_v8 = vmul.f32 %v235_v3, %v235_v3  ;;  %v154_v9 = vpop.f32.mrb[10].mxu0  ;;  %v273_v20 = vsel %vm272_vm1, %v568_v29, %v271_v4  ;;  %v331_v37 = vand.u32 2147483648, %v590_v55 }
  0xf9   :  { %v237_v10 = vpop.f32.mrb[10].mxu1  ;;  %v472_v13 = vpop.eup %471  ;;  %v278_v16 = vmul.f32 %v470_v6, %v573_v33  ;;  %v308_v22 = vsel %vm307_vm2, %v570_v30, %v306_v11  ;;  %v640_v28 = vsel %vm274_vm4, %v275_v53, %v273_v20  ;;  %v342_v38 = vmax.f32 %v580_v49, 1e-10 }
  0xfa   :  { %v155_v14 = vpop.f32.mrb[11].mxu0  ;;  %v238_v15 = vpop.f32.mrb[11].mxu1  ;;  %v612_v17 = vadd.f32 %v249_v7, %v244_v0  ;;  %v614_v18 = vadd.f32 %v264_v8, %v259_v1  ;;  %v313_v23 = vmul.f32 %v472_v13, %v575_v34  ;;  %v648_v32 = vsel %vm309_vm6, %v310_v57, %v308_v22 }
  0xfb   :  { %v280_v21 = vsel %vm279_vm3, %v573_v33, %v278_v16  ;;  %v343_v29 = vmax.f32 %v588_v54, 1e-10  ;;  %v361_v43 = vmax.f32 %v575_v34, 1e-10  ;;  %v362_v46 = vmax.f32 %v582_v50, 1e-10 }
  0xfc   :  { %481 = vrsqrt.f32 %v612_v17  ;;  %v315_v25 = vsel %vm314_vm7, %v575_v34, %v313_v23  ;;  %v644_v31 = vsel %vm281_vm5, %v282_v56, %v280_v21  ;;  %v344_v40 = vmax.f32 %v612_v17, 1e-10 }
  0xfd   :  { %483 = vrsqrt.f32 %v614_v18  ;;  %v474_v27 = vpop.eup %473  ;;  %v657_v33 = vsel %vm316_vm8, %v317_v61, %v315_v25  ;;  %v380_v34 = vsub.f32 %v640_v28, %v648_v32  ;;  %v363_v52 = vmax.f32 %v590_v55, 1e-10 }
  0xfe   :  { %v476_v35 = vpop.eup %475  ;;  %v285_v36 = vmul.f32 %v474_v27, %v580_v49  ;;  %485 = vlog2.f32 %v340_v62  ;;  %v381_v53 = vsub.f32 %v644_v31, %v657_v33  ;;  %vm300_vm0 = vcmp.eq.f32.partialorder %v612_v17, inf }
  0xff   :  { %v478_v39 = vpop.eup %477  ;;  %v320_v30 = vmul.f32 %v476_v35, %v582_v50  ;;  %487 = vlog2.f32 %v341_v5  ;;  %vm330_vm1 = vcmp.eq.f32.partialorder %v590_v55, 0.0  ;;  %vm302_vm2 = vcmp.eq.f32.partialorder %v612_v17, 0.0 }
 0x100   :  { %v287_v41 = vsel %vm286_vm9, %v580_v49, %v285_v36  ;;  %v292_v42 = vmul.f32 %v478_v39, %v588_v54  ;;  %489 = vlog2.f32 %v342_v38  ;;  %v480_v47 = vpop.eup %479  ;;  %v303_v62 = vand.u32 2147483648, %v612_v17 }
 0x101   :  { %v668_v44 = vsel %vm288_vm10, %v289_v19, %v287_v41  ;;  %v322_v45 = vsel %vm321_vm11, %v582_v50, %v320_v30  ;;  %491 = vlog2.f32 %v343_v29  ;;  %v327_v49 = vmul.f32 %v480_v47, %v590_v55 }
 0x102   :  { %v294_v48 = vsel %vm293_vm12, %v588_v54, %v292_v42  ;;  %v679_v51 = vsel %vm323_vm14, %v324_v26, %v322_v45  ;;  %493 = vlog2.f32 %v344_v40  ;;  %v364_v50 = vmax.f32 %v614_v18, 1e-10 }
 0x103   :  { %v689_v56 = vsel %vm295_vm13, %v296_v24, %v294_v48  ;;  %495 = vlog2.f32 %v360_v12  ;;  %v382_v57 = vsub.f32 %v668_v44, %v679_v51  ;;  %v329_v59 = vsel %vm328_vm15, %v590_v55, %v327_v49 }
 0x104   :  { %497 = vlog2.f32 %v361_v43  ;;  %v332_v61 = vsel %vm330_vm1, %v331_v37, %v329_v59  ;;  %vm335_vm3 = vcmp.eq.f32.partialorder %v614_v18, inf  ;;  %v338_v55 = vand.u32 2147483648, %v614_v18 }
 0x105   :  { %499 = vlog2.f32 %v362_v46  ;;  %v383_v0 = vsub.f32 %v689_v56, %v332_v61  ;;  %vm337_vm4 = vcmp.eq.f32.partialorder %v614_v18, 0.0  ;;  %v385_v41 = vand.u32 2147483647, %v380_v34 }
 0x106   :  { %v482_v58 = vpop.eup %481  ;;  %501 = vlog2.f32 %v363_v52  ;;  %v386_v44 = vand.u32 2147483647, %v381_v53  ;;  %v387_v47 = vand.u32 2147483647, %v382_v57 }
 0x107   :  { %v484_v60 = vpop.eup %483  ;;  %v299_v54 = vmul.f32 %v482_v58, %v612_v17  ;;  %503 = vlog2.f32 %v364_v50  ;;  %v388_v52 = vand.u32 2147483647, %v383_v0 }
 0x108   :  { %v334_v63 = vmul.f32 %v484_v60, %v614_v18  ;;  %v486_v2 = vpop.eup %485 }
 0x109   :  { %v301_v1 = vsel %vm300_vm0, %v612_v17, %v299_v54  ;;  %v488_v5 = vpop.eup %487  ;;  %v346_v8 = vmul.f32 0.6931472, %v486_v2 }
 0x10a   :  { %v304_v3 = vsel %vm302_vm2, %v303_v62, %v301_v1  ;;  %v336_v4 = vsel %vm335_vm3, %v614_v18, %v334_v63  ;;  %v490_v7 = vpop.eup %489  ;;  %v348_v11 = vmul.f32 0.6931472, %v488_v5 }
 0x10b   :  { %v339_v6 = vsel %vm337_vm4, %v338_v55, %v336_v4  ;;  %v492_v10 = vpop.eup %491  ;;  %v350_v13 = vmul.f32 0.6931472, %v490_v7  ;;  %v355_v19 = vmul.f32 0.4342945, %v346_v8 }
 0x10c   :  { %v384_v9 = vsub.f32 %v304_v3, %v339_v6  ;;  %v494_v12 = vpop.eup %493  ;;  %v352_v15 = vmul.f32 0.6931472, %v492_v10  ;;  %v356_v22 = vmul.f32 0.4342945, %v348_v11 }
 0x10d   :  { %v496_v14 = vpop.eup %495  ;;  %v354_v17 = vmul.f32 0.6931472, %v494_v12  ;;  %v357_v18 = vmul.f32 0.4342945, %v350_v13 }
 0x10e   :  { %v498_v16 = vpop.eup %497  ;;  %v366_v20 = vmul.f32 0.6931472, %v496_v14  ;;  %v358_v31 = vmul.f32 0.4342945, %v352_v15  ;;  %v389_v58 = vand.u32 2147483647, %v384_v9 }
 0x10f   :  { %v500_v21 = vpop.eup %499  ;;  %v368_v23 = vmul.f32 0.6931472, %v498_v16  ;;  %v359_v37 = vmul.f32 0.4342945, %v354_v17 }
 0x110   :  { %v502_v24 = vpop.eup %501  ;;  %v370_v25 = vmul.f32 0.6931472, %v500_v21  ;;  %v375_v26 = vmul.f32 0.4342945, %v366_v20 }
 0x111   :  { %v504_v27 = vpop.eup %503  ;;  %v372_v35 = vmul.f32 0.6931472, %v502_v24  ;;  %v376_v36 = vmul.f32 0.4342945, %v368_v23 }
 0x112   :  { %v374_v38 = vmul.f32 0.6931472, %v504_v27  ;;  %v377_v29 = vmul.f32 0.4342945, %v370_v25  ;;  %v390_v39 = vsub.f32 %v355_v19, %v375_v26 }
 0x113   :  { %v378_v33 = vmul.f32 0.4342945, %v372_v35  ;;  %v391_v30 = vsub.f32 %v356_v22, %v376_v36 }
 0x114   :  { %v379_v40 = vmul.f32 0.4342945, %v374_v38  ;;  %v392_v42 = vsub.f32 %v357_v18, %v377_v29  ;;  %v395_v43 = vand.u32 2147483647, %v390_v39 }
 0x115   :  { %v393_v45 = vsub.f32 %v358_v31, %v378_v33  ;;  %v396_v46 = vand.u32 2147483647, %v391_v30 }
 0x116   :  { %v394_v48 = vsub.f32 %v359_v37, %v379_v40  ;;  %v397_v51 = vand.u32 2147483647, %v392_v42  ;;  %v400_v49 = vadd.f32 %v395_v43, %v385_v41 }
 0x117   :  { %v398_v56 = vand.u32 2147483647, %v393_v45  ;;  %v401_v50 = vadd.f32 %v396_v46, %v386_v44 }
 0x118   :  { %v399_v59 = vand.u32 2147483647, %v394_v48  ;;  %v402_v60 = vadd.f32 %v397_v51, %v387_v47 }
 0x119   :  { %v403_v54 = vadd.f32 %v398_v56, %v388_v52  ;;  %v405_v61 = vadd.f32 %v401_v50, %v400_v49 }
 0x11a   :  { %v404_v62 = vadd.f32 %v399_v59, %v389_v58 }
 0x11b   :  { %v406_v28 = vadd.f32 %v405_v61, %v402_v60 }
 0x11d   :  { %v407_v32 = vadd.f32 %v406_v28, %v403_v54 }
 0x11f   :  { %v408_v34 = vadd.f32 %v407_v32, %v404_v62 }
 0x121   :  { %409 = vadd.xlane.f32.xlu0 %v408_v34 }
 0x1ae   :  { %v410_v53 = vpop.xlane.xlu0 %409 }
 0x1af   :  { %v411_v63 = vrot.slane %v410_v53, 4 }
 0x1b1   :  { %v412_v1 = vadd.f32 %v411_v63, %v410_v53 }
 0x1b3   :  { %v413_v57 = vrot.slane %v412_v1, 2 }
 0x1b5   :  { %v414_v55 = vadd.f32 %v413_v57, %v412_v1 }
 0x1b7   :  { %v415_v2 = vrot.slane %v414_v55, 1 }
 0x1b9   :  { %v416_v3 = vadd.f32 %v415_v2, %v414_v55 }
 0x1bb   :  { %444 = vpush %v416_v3 }
 0x1ec   :  { %s445_s0 = spop %444 }
 0x1ed   :  { %v418_v0 = vstv %s445_s0 }
 0x1ee   :  { %419 = vst [vmem:[%s718_s3] sm:$0xff] %v418_v0 }

</bundles_post_ra>
